<compile_context>
chip_gen: v7x
topology: tpu7x:2x2x1
jax: 0.10.0
libtpu: 0.0.40
codegen_flags: <defaults>
</compile_context>

<pallas_src>
import functools

import jax
import jax.numpy as jnp
import numpy as np
from jax.experimental import pallas as pl
from jax.experimental.pallas import tpu as pltpu


def _round_up(x, m):
    return (x + m - 1) // m * m


def _pad_to(a, shape):
    pads = [(0, t - s) for s, t in zip(a.shape, shape)]
    if any(p for _, p in pads):
        a = jnp.pad(a, pads)
    return a


# ----------------------------------------------------------------------------
# Fused kernel:
#   accumulate  Y^T += Ax_tile @ GU^T_tile   (complex, f32 accumulation)
#   at the last reduction step: apply the phi cross-slice mixing and the rdcf
#   density-compensation scaling in the epilogue, in-place on the output tile.
# Layouts (lane dim = M slab):
#   ax  : (Bp, tk)   f32      GU^T : (tk, tn) bf16 (pre-packed)
#   phi : (nslc, tn) f32      rdcf : (1, tn)  f32
#   out : (Bp, tn)   f32 (real / imag pair), resident across the k axis
# ----------------------------------------------------------------------------
def _interp_mix_kernel(axr_ref, axi_ref, gtr_ref, gti_ref,
                       pr_ref, pi_ref, dr_ref, di_ref,
                       yr_ref, yi_ref, *, batch, nslc, ncoils):
    k = pl.program_id(1)

    @pl.when(k == 0)
    def _():
        yr_ref[...] = jnp.zeros_like(yr_ref)
        yi_ref[...] = jnp.zeros_like(yi_ref)

    ar = axr_ref[...]                              # (Bp, tk) f32
    ai = axi_ref[...]
    gr = gtr_ref[...].astype(jnp.float32)          # (tk, tn) bf16 -> f32
    gi = gti_ref[...].astype(jnp.float32)

    yr_ref[...] += (jnp.dot(ar, gr, preferred_element_type=jnp.float32)
                    - jnp.dot(ai, gi, preferred_element_type=jnp.float32))
    yi_ref[...] += (jnp.dot(ar, gi, preferred_element_type=jnp.float32)
                    + jnp.dot(ai, gr, preferred_element_type=jnp.float32))

    @pl.when(k == pl.num_programs(1) - 1)
    def _():
        # Load the fully accumulated block once, then rewrite it row-by-row.
        accr = yr_ref[...]                          # (Bp, tn)
        acci = yi_ref[...]
        phr = pr_ref[...]                           # (nslc, tn)
        phm = pi_ref[...]
        dcr = dr_ref[...]                           # (1, tn)
        dci = di_ref[...]

        # Hoisted cross-slice weights w[r,s] = phi[s] * conj(phi[r]), s != r.
        # (nslc is small; watch vreg pressure only if nslc gets large.)
        wr, wi = {}, {}
        for r in range(nslc):
            prr = phr[r:r + 1, :]
            pri = phm[r:r + 1, :]
            for s in range(nslc):
                if s != r:
                    psr = phr[s:s + 1, :]
                    psi = phm[s:s + 1, :]
                    wr[(r, s)] = psr * prr + psi * pri
                    wi[(r, s)] = psi * prr - psr * pri

        for b in range(batch):
            for c in range(ncoils):
                base = b * nslc * ncoils + c
                xs_r = [accr[base + s * ncoils: base + s * ncoils + 1, :]
                        for s in range(nslc)]
                xs_i = [acci[base + s * ncoils: base + s * ncoils + 1, :]
                        for s in range(nslc)]
                for r in range(nslc):
                    mr = xs_r[r]
                    mi = xs_i[r]
                    for s in range(nslc):
                        if s != r:
                            mr = mr + xs_r[s] * wr[(r, s)] - xs_i[s] * wi[(r, s)]
                            mi = mi + xs_r[s] * wi[(r, s)] + xs_i[s] * wr[(r, s)]
                    row = base + r * ncoils
                    yr_ref[row:row + 1, :] = mr * dcr - mi * dci
                    yi_ref[row:row + 1, :] = mr * dci + mi * dcr


def fused_interp_mix(axr, axi, gtr, gti, ph_r, ph_i, dc_r, dc_i, *,
                     batch, nslc, ncoils, tk=1024, tn=512):
    Bflat, KN = axr.shape
    M = gtr.shape[1]
    nslc_rows = ph_r.shape[0]

    # Tile selection + zero padding (no hard divisibility requirements).
    tn = min(tn, _round_up(M, 128))
    tk = min(tk, _round_up(KN, 128))
    Bp = _round_up(Bflat, 8)           # fill the 8 sublanes of output/LHS vregs
    Mp = _round_up(M, tn)
    KNp = _round_up(KN, tk)

    axr = _pad_to(axr, (Bp, KNp))
    axi = _pad_to(axi, (Bp, KNp))
    gtr = _pad_to(gtr, (KNp, Mp))
    gti = _pad_to(gti, (KNp, Mp))
    ph_r = _pad_to(ph_r, (nslc_rows, Mp))
    ph_i = _pad_to(ph_i, (nslc_rows, Mp))
    dc_r = _pad_to(dc_r, (1, Mp))
    dc_i = _pad_to(dc_i, (1, Mp))

    grid = (Mp // tn, KNp // tk)       # (parallel over M, reduction over KN)

    kernel = functools.partial(_interp_mix_kernel,
                               batch=batch, nslc=nslc, ncoils=ncoils)

    gu_itemsize = jnp.dtype(gtr.dtype).itemsize
    cost = pl.CostEstimate(
        flops=8 * Bp * KNp * Mp + 16 * nslc * nslc * Bflat * Mp,
        transcendentals=0,
        bytes_accessed=(2 * KNp * Mp * gu_itemsize          # GU streamed once
                        + 2 * Bp * KNp * 4 * (Mp // tn)      # Ax per M tile
                        + 2 * Bp * Mp * 4                    # outputs
                        + (2 * nslc_rows + 2) * Mp * 4))     # phi + rdcf

    yr, yi = pl.pallas_call(
        kernel,
        out_shape=(jax.ShapeDtypeStruct((Bp, Mp), jnp.float32),
                   jax.ShapeDtypeStruct((Bp, Mp), jnp.float32)),
        grid_spec=pltpu.PrefetchScalarGridSpec(
            num_scalar_prefetch=0,
            grid=grid,
            in_specs=[
                pl.BlockSpec((Bp, tk), lambda i, k: (0, k)),
                pl.BlockSpec((Bp, tk), lambda i, k: (0, k)),
                pl.BlockSpec((tk, tn), lambda i, k: (k, i)),
                pl.BlockSpec((tk, tn), lambda i, k: (k, i)),
                pl.BlockSpec((nslc_rows, tn), lambda i, k: (0, i)),
                pl.BlockSpec((nslc_rows, tn), lambda i, k: (0, i)),
                pl.BlockSpec((1, tn), lambda i, k: (0, i)),
                pl.BlockSpec((1, tn), lambda i, k: (0, i)),
            ],
            out_specs=[
                pl.BlockSpec((Bp, tn), lambda i, k: (0, i)),
                pl.BlockSpec((Bp, tn), lambda i, k: (0, i)),
            ],
        ),
        compiler_params=pltpu.CompilerParams(
            dimension_semantics=("parallel", "arbitrary")),
        cost_estimate=cost,
    )(axr, axi, gtr, gti, ph_r, ph_i, dc_r, dc_i)

    return yr[:Bflat, :M], yi[:Bflat, :M]


# ----------------------------------------------------------------------------
# One-time GU packing (outside the hot path): transpose to (KN, M) so M lands
# on lanes, and cast to bf16 to halve the dominant HBM stream.
# ----------------------------------------------------------------------------
def prepare_gu(gur, gui, dtype=jnp.bfloat16):
    return (jnp.asarray(gur).T.astype(dtype),
            jnp.asarray(gui).T.astype(dtype))


# ----------------------------------------------------------------------------
# Forward wrapper == LowRankNufftOperator.forward (sens=None configuration)
# ----------------------------------------------------------------------------
@functools.partial(jax.jit, static_argnames=("grid_size", "tk", "tn"))
def low_rank_nufft_forward(x, apod, gut_r, gut_i, phi, rdcf, *,
                           grid_size, tk=1024, tn=512):
    batch, nslc, ncoils, K, nr, nc = x.shape
    gx, gy = grid_size
    KN = K * gx * gy
    M = gut_r.shape[1]
    Bflat = batch * nslc * ncoils

    # apodization (elementwise complex) — glue
    Ax = apod[None, None, None, None, :, :] * x
    # self.sens is None for this operator instance -> no coil multiply.
    # TODO(synk): zero-padded fft2 has no Pallas primitive; executed by XLA.
    Ax = jnp.fft.fft2(Ax, s=grid_size, axes=(-2, -1))
    Ax = Ax.reshape(Bflat, KN)                       # no transpose needed

    yr, yi = fused_interp_mix(
        jnp.real(Ax).astype(jnp.float32),
        jnp.imag(Ax).astype(jnp.float32),
        gut_r, gut_i,
        jnp.real(phi).astype(jnp.float32),
        jnp.imag(phi).astype(jnp.float32),
        jnp.real(rdcf).astype(jnp.float32)[None, :],
        jnp.imag(rdcf).astype(jnp.float32)[None, :],
        batch=batch, nslc=nslc, ncoils=ncoils, tk=tk, tn=tn)

    y = (yr + 1j * yi).astype(jnp.complex64).reshape(batch, nslc, ncoils, M)
    # torch returns y.permute(1, 2, 0, 3) of (M, batch, nslc, ncoils)
    #   -> (batch, nslc, M, ncoils)
    return jnp.transpose(y, (0, 1, 3, 2))


# ----------------------------------------------------------------------------
# Pure numpy reference (mirrors the torch forward exactly, f64, dense GU)
# ----------------------------------------------------------------------------
def reference_forward(x, apod, gur, gui, phi, rdcf, grid_size):
    x = np.asarray(x, np.complex128)
    apod = np.asarray(apod, np.complex128)
    GU = np.asarray(gur, np.float64) + 1j * np.asarray(gui, np.float64)
    phi = np.asarray(phi, np.complex128)
    rdcf = np.asarray(rdcf, np.complex128)

    batch, nslc, ncoils, K, nr, nc = x.shape
    gx, gy = grid_size

    Ax = apod[None, None, None, None, :, :] * x
    pad = np.zeros((batch, nslc, ncoils, K, gx, gy), np.complex128)
    pad[..., :nr, :nc] = Ax
    Ax = np.fft.fft2(pad, axes=(-2, -1))
    Ax = Ax.reshape(batch * nslc * ncoils, -1).T            # (K*Ng, Bflat)
    GUAx = GU @ Ax                                          # (M, Bflat)
    Ax4 = GUAx.reshape(-1, batch, nslc, ncoils)

    y = Ax4.copy()
    for r in range(nslc):
        for s in range(nslc):
            if s != r:
                ys = Ax4[:, :, s, :] * phi[s, :][:, None, None]
                ys = ys * np.conj(phi[r, :])[:, None, None]
                y[:, :, r, :] += ys
    y = y * rdcf[:, None, None, None]
    return np.transpose(y, (1, 2, 0, 3))                    # (batch, nslc, M, ncoils)


# ----------------------------------------------------------------------------
if __name__ == "__main__":
    # Small synthetic problem consistent with the module's shapes.
    nseg, T, nread = 2, 4, 24
    M = nseg * T * nread              # 192 k-space samples (exercises M padding)
    grid_size = (16, 16)
    im_size = (8, 8)
    K = 4                             # low-rank basis size
    batch, nslc, ncoils = 2, 2, 1     # sens=None -> ncoils=1
    KN = K * grid_size[0] * grid_size[1]

    key = jax.random.PRNGKey(0)
    k1, k2, k3, k4, k5, k6, k7 = jax.random.split(key, 7)

    # x: (batch, nslc, ncoils, K, nrows, ncols) complex64
    x = (jax.random.normal(k1, (batch, nslc, ncoils, K, *im_size), jnp.float32)
         + 1j * jax.random.normal(k2, (batch, nslc, ncoils, K, *im_size), jnp.float32)
         ).astype(jnp.complex64)

    # apodization (Kaiser-Bessel scaling coefficients) — real-valued, ~1
    apod = (1.0 + 0.1 * jax.random.normal(k3, im_size, jnp.float32)
            ).astype(jnp.complex64)

    # GU interpolation matrix (dense stand-in for the sparse NUFFT matrix)
    gur = jax.random.normal(k4, (M, KN), jnp.float32) / np.sqrt(KN)
    gui = jax.random.normal(k5, (M, KN), jnp.float32) / np.sqrt(KN)

    # phi: (nslc, M) complex slice-encoding phases (unit magnitude)
    phi_angle = jax.random.uniform(k6, (nslc, M), jnp.float32, 0.0, 2 * np.pi)
    phi = (jnp.cos(phi_angle) + 1j * jnp.sin(phi_angle)).astype(jnp.complex64)

    # rdcf: (M,) density compensation, real positive, cast to complex64
    rdcf = (0.5 + jax.random.uniform(k7, (M,), jnp.float32)).astype(jnp.complex64)

    # One-time pack of GU^T to bf16 (done outside the forward hot path).
    gut_r, gut_i = prepare_gu(gur, gui, dtype=jnp.bfloat16)

    # Small tiles at test size so the grid exercises multiple steps on both the
    # parallel (M) and reduction (KN) axes, plus the padding paths.
    # Production defaults: tk=1024, tn=512.
    out = low_rank_nufft_forward(x, apod, gut_r, gut_i, phi, rdcf,
                                 grid_size=grid_size, tk=384, tn=128)
    out = jax.block_until_ready(out)

    ref = reference_forward(np.asarray(x), np.asarray(apod), np.asarray(gur),
                            np.asarray(gui), np.asarray(phi), np.asarray(rdcf),
                            grid_size)

    assert out.shape == (batch, nslc, M, ncoils), out.shape
    err = np.linalg.norm(np.asarray(out) - ref) / np.linalg.norm(ref)
    # Error budget: bf16-packed GU contributes ~2e-3 relative error; the f32
    # accumulation / FFT path contributes ~1e-6. 1e-2 gives ~5x margin.
    assert err < 1e-2, f"relative error too large: {err}"

    print("KERNEL_OK")
</pallas_src>

<mosaic_0001>
module attributes {stable_mosaic.version = 11 : i64} {
  func.func @_interp_mix_kernel(%arg0: i32, %arg1: i32, %arg2: memref<8x384xf32, #tpu.memory_space<vmem>>, %arg3: memref<8x384xf32, #tpu.memory_space<vmem>>, %arg4: memref<384x128xbf16, #tpu.memory_space<vmem>>, %arg5: memref<384x128xbf16, #tpu.memory_space<vmem>>, %arg6: memref<2x128xf32, #tpu.memory_space<vmem>>, %arg7: memref<2x128xf32, #tpu.memory_space<vmem>>, %arg8: memref<1x128xf32, #tpu.memory_space<vmem>>, %arg9: memref<1x128xf32, #tpu.memory_space<vmem>>, %arg10: memref<8x128xf32, #tpu.memory_space<vmem>>, %arg11: memref<8x128xf32, #tpu.memory_space<vmem>>) attributes {dimension_semantics = [#tpu.dimension_semantics<parallel>, #tpu.dimension_semantics<arbitrary>], iteration_bounds = array<i64: 2, 3>, scalar_prefetch = 0 : i64, scratch_operands = 0 : i64, tpu.core_type = #tpu.core_type<tc>, window_params = [{transform_indices = @transform_0, window_bounds = array<i64: 8, 384>}, {transform_indices = @transform_1, window_bounds = array<i64: 8, 384>}, {transform_indices = @transform_2, window_bounds = array<i64: 384, 128>}, {transform_indices = @transform_3, window_bounds = array<i64: 384, 128>}, {transform_indices = @transform_4, window_bounds = array<i64: 2, 128>}, {transform_indices = @transform_5, window_bounds = array<i64: 2, 128>}, {transform_indices = @transform_6, window_bounds = array<i64: 1, 128>}, {transform_indices = @transform_7, window_bounds = array<i64: 1, 128>}, {transform_indices = @transform_8, window_bounds = array<i64: 8, 128>}, {transform_indices = @transform_9, window_bounds = array<i64: 8, 128>}]} {
    %c0_i32 = arith.constant 0 : i32
    %0 = arith.cmpi eq, %arg1, %c0_i32 : i32
    %1 = arith.extui %0 : i1 to i32
    %c0_i32_0 = arith.constant 0 : i32
    %2 = arith.cmpi ne, %1, %c0_i32_0 : i32
    scf.if %2 {
      %cst_20 = arith.constant 0.000000e+00 : f32
      %24 = vector.broadcast %cst_20 : f32 to vector<8x128xf32>
      %c0_21 = arith.constant 0 : index
      %c0_22 = arith.constant 0 : index
      %25 = vector.load %arg10[%c0_21, %c0_22] : memref<8x128xf32, #tpu.memory_space<vmem>>, vector<8x128xf32>
      tpu.vector_store %arg10[%c0_21, %c0_22], %24 {strides = array<i32>} : memref<8x128xf32, #tpu.memory_space<vmem>>, vector<8x128xf32>,
      %cst_23 = arith.constant 0.000000e+00 : f32
      %26 = vector.broadcast %cst_23 : f32 to vector<8x128xf32>
      %c0_24 = arith.constant 0 : index
      %c0_25 = arith.constant 0 : index
      %27 = vector.load %arg11[%c0_24, %c0_25] : memref<8x128xf32, #tpu.memory_space<vmem>>, vector<8x128xf32>
      tpu.vector_store %arg11[%c0_24, %c0_25], %26 {strides = array<i32>} : memref<8x128xf32, #tpu.memory_space<vmem>>, vector<8x128xf32>,
    } else {
    }
    %c0 = arith.constant 0 : index
    %c0_1 = arith.constant 0 : index
    %3 = vector.load %arg2[%c0, %c0_1] : memref<8x384xf32, #tpu.memory_space<vmem>>, vector<8x384xf32>
    %c0_2 = arith.constant 0 : index
    %c0_3 = arith.constant 0 : index
    %4 = vector.load %arg3[%c0_2, %c0_3] : memref<8x384xf32, #tpu.memory_space<vmem>>, vector<8x384xf32>
    %c0_4 = arith.constant 0 : index
    %c0_5 = arith.constant 0 : index
    %5 = vector.load %arg4[%c0_4, %c0_5] : memref<384x128xbf16, #tpu.memory_space<vmem>>, vector<384x128xbf16>
    %6 = arith.extf %5 : vector<384x128xbf16> to vector<384x128xf32>
    %c0_6 = arith.constant 0 : index
    %c0_7 = arith.constant 0 : index
    %7 = vector.load %arg5[%c0_6, %c0_7] : memref<384x128xbf16, #tpu.memory_space<vmem>>, vector<384x128xbf16>
    %8 = arith.extf %7 : vector<384x128xbf16> to vector<384x128xf32>
    %c0_8 = arith.constant 0 : index
    %c0_9 = arith.constant 0 : index
    %9 = vector.load %arg10[%c0_8, %c0_9] : memref<8x128xf32, #tpu.memory_space<vmem>>, vector<8x128xf32>
    %cst = arith.constant dense<0.000000e+00> : vector<8x128xf32>
    %10 = tpu.matmul %3, %6, %cst {dimension_numbers = #tpu.dot_dimension_numbers<[1], [0], [0], [1], [0, 0, 1, 1], [], []>} : vector<8x384xf32>, vector<384x128xf32>, vector<8x128xf32> -> vector<8x128xf32>
    %cst_10 = arith.constant dense<0.000000e+00> : vector<8x128xf32>
    %11 = tpu.matmul %4, %8, %cst_10 {dimension_numbers = #tpu.dot_dimension_numbers<[1], [0], [0], [1], [0, 0, 1, 1], [], []>} : vector<8x384xf32>, vector<384x128xf32>, vector<8x128xf32> -> vector<8x128xf32>
    %12 = arith.subf %10, %11 : vector<8x128xf32>
    %13 = arith.addf %9, %12 : vector<8x128xf32>
    %c0_11 = arith.constant 0 : index
    %c0_12 = arith.constant 0 : index
    %14 = vector.load %arg10[%c0_11, %c0_12] : memref<8x128xf32, #tpu.memory_space<vmem>>, vector<8x128xf32>
    tpu.vector_store %arg10[%c0_11, %c0_12], %13 {strides = array<i32>} : memref<8x128xf32, #tpu.memory_space<vmem>>, vector<8x128xf32>,
    %c0_13 = arith.constant 0 : index
    %c0_14 = arith.constant 0 : index
    %15 = vector.load %arg11[%c0_13, %c0_14] : memref<8x128xf32, #tpu.memory_space<vmem>>, vector<8x128xf32>
    %cst_15 = arith.constant dense<0.000000e+00> : vector<8x128xf32>
    %16 = tpu.matmul %3, %8, %cst_15 {dimension_numbers = #tpu.dot_dimension_numbers<[1], [0], [0], [1], [0, 0, 1, 1], [], []>} : vector<8x384xf32>, vector<384x128xf32>, vector<8x128xf32> -> vector<8x128xf32>
    %cst_16 = arith.constant dense<0.000000e+00> : vector<8x128xf32>
    %17 = tpu.matmul %4, %6, %cst_16 {dimension_numbers = #tpu.dot_dimension_numbers<[1], [0], [0], [1], [0, 0, 1, 1], [], []>} : vector<8x384xf32>, vector<384x128xf32>, vector<8x128xf32> -> vector<8x128xf32>
    %18 = arith.addf %16, %17 : vector<8x128xf32>
    %19 = arith.addf %15, %18 : vector<8x128xf32>
    %c0_17 = arith.constant 0 : index
    %c0_18 = arith.constant 0 : index
    %20 = vector.load %arg11[%c0_17, %c0_18] : memref<8x128xf32, #tpu.memory_space<vmem>>, vector<8x128xf32>
    tpu.vector_store %arg11[%c0_17, %c0_18], %19 {strides = array<i32>} : memref<8x128xf32, #tpu.memory_space<vmem>>, vector<8x128xf32>,
    %c2_i32 = arith.constant 2 : i32
    %21 = arith.cmpi eq, %arg1, %c2_i32 : i32
    %22 = arith.extui %21 : i1 to i32
    %c0_i32_19 = arith.constant 0 : i32
    %23 = arith.cmpi ne, %22, %c0_i32_19 : i32
    scf.if %23 {
      %c0_20 = arith.constant 0 : index
      %c0_21 = arith.constant 0 : index
      %24 = vector.load %arg10[%c0_20, %c0_21] : memref<8x128xf32, #tpu.memory_space<vmem>>, vector<8x128xf32>
      %c0_22 = arith.constant 0 : index
      %c0_23 = arith.constant 0 : index
      %25 = vector.load %arg11[%c0_22, %c0_23] : memref<8x128xf32, #tpu.memory_space<vmem>>, vector<8x128xf32>
      %c0_24 = arith.constant 0 : index
      %c0_25 = arith.constant 0 : index
      %26 = vector.load %arg6[%c0_24, %c0_25] : memref<2x128xf32, #tpu.memory_space<vmem>>, vector<2x128xf32>
      %c0_26 = arith.constant 0 : index
      %c0_27 = arith.constant 0 : index
      %27 = vector.load %arg7[%c0_26, %c0_27] : memref<2x128xf32, #tpu.memory_space<vmem>>, vector<2x128xf32>
      %c0_28 = arith.constant 0 : index
      %c0_29 = arith.constant 0 : index
      %28 = vector.load %arg8[%c0_28, %c0_29] : memref<1x128xf32, #tpu.memory_space<vmem>>, vector<1x128xf32>
      %c0_30 = arith.constant 0 : index
      %c0_31 = arith.constant 0 : index
      %29 = vector.load %arg9[%c0_30, %c0_31] : memref<1x128xf32, #tpu.memory_space<vmem>>, vector<1x128xf32>
      %30 = vector.extract_strided_slice %26 {offsets = [0, 0], sizes = [1, 128], strides = [1, 1]} : vector<2x128xf32> to vector<1x128xf32>
      %31 = vector.extract_strided_slice %27 {offsets = [0, 0], sizes = [1, 128], strides = [1, 1]} : vector<2x128xf32> to vector<1x128xf32>
      %32 = vector.extract_strided_slice %26 {offsets = [1, 0], sizes = [1, 128], strides = [1, 1]} : vector<2x128xf32> to vector<1x128xf32>
      %33 = vector.extract_strided_slice %27 {offsets = [1, 0], sizes = [1, 128], strides = [1, 1]} : vector<2x128xf32> to vector<1x128xf32>
      %34 = arith.mulf %32, %30 : vector<1x128xf32>
      %35 = arith.mulf %33, %31 : vector<1x128xf32>
      %36 = arith.addf %34, %35 : vector<1x128xf32>
      %37 = arith.mulf %33, %30 : vector<1x128xf32>
      %38 = arith.mulf %32, %31 : vector<1x128xf32>
      %39 = arith.subf %37, %38 : vector<1x128xf32>
      %40 = vector.extract_strided_slice %26 {offsets = [1, 0], sizes = [1, 128], strides = [1, 1]} : vector<2x128xf32> to vector<1x128xf32>
      %41 = vector.extract_strided_slice %27 {offsets = [1, 0], sizes = [1, 128], strides = [1, 1]} : vector<2x128xf32> to vector<1x128xf32>
      %42 = vector.extract_strided_slice %26 {offsets = [0, 0], sizes = [1, 128], strides = [1, 1]} : vector<2x128xf32> to vector<1x128xf32>
      %43 = vector.extract_strided_slice %27 {offsets = [0, 0], sizes = [1, 128], strides = [1, 1]} : vector<2x128xf32> to vector<1x128xf32>
      %44 = arith.mulf %42, %40 : vector<1x128xf32>
      %45 = arith.mulf %43, %41 : vector<1x128xf32>
      %46 = arith.addf %44, %45 : vector<1x128xf32>
      %47 = arith.mulf %43, %40 : vector<1x128xf32>
      %48 = arith.mulf %42, %41 : vector<1x128xf32>
      %49 = arith.subf %47, %48 : vector<1x128xf32>
      %50 = vector.extract_strided_slice %24 {offsets = [0, 0], sizes = [1, 128], strides = [1, 1]} : vector<8x128xf32> to vector<1x128xf32>
      %51 = vector.extract_strided_slice %24 {offsets = [1, 0], sizes = [1, 128], strides = [1, 1]} : vector<8x128xf32> to vector<1x128xf32>
      %52 = vector.extract_strided_slice %25 {offsets = [0, 0], sizes = [1, 128], strides = [1, 1]} : vector<8x128xf32> to vector<1x128xf32>
      %53 = vector.extract_strided_slice %25 {offsets = [1, 0], sizes = [1, 128], strides = [1, 1]} : vector<8x128xf32> to vector<1x128xf32>
      %54 = arith.mulf %51, %36 : vector<1x128xf32>
      %55 = arith.addf %50, %54 : vector<1x128xf32>
      %56 = arith.mulf %53, %39 : vector<1x128xf32>
      %57 = arith.subf %55, %56 : vector<1x128xf32>
      %58 = arith.mulf %51, %39 : vector<1x128xf32>
      %59 = arith.addf %52, %58 : vector<1x128xf32>
      %60 = arith.mulf %53, %36 : vector<1x128xf32>
      %61 = arith.addf %59, %60 : vector<1x128xf32>
      %62 = arith.mulf %57, %28 : vector<1x128xf32>
      %63 = arith.mulf %61, %29 : vector<1x128xf32>
      %64 = arith.subf %62, %63 : vector<1x128xf32>
      %c0_32 = arith.constant 0 : index
      %c0_33 = arith.constant 0 : index
      %65 = vector.load %arg10[%c0_32, %c0_33] : memref<8x128xf32, #tpu.memory_space<vmem>>, vector<1x128xf32>
      tpu.vector_store %arg10[%c0_32, %c0_33], %64 {strides = array<i32>} : memref<8x128xf32, #tpu.memory_space<vmem>>, vector<1x128xf32>,
      %66 = arith.mulf %57, %29 : vector<1x128xf32>
      %67 = arith.mulf %61, %28 : vector<1x128xf32>
      %68 = arith.addf %66, %67 : vector<1x128xf32>
      %c0_34 = arith.constant 0 : index
      %c0_35 = arith.constant 0 : index
      %69 = vector.load %arg11[%c0_34, %c0_35] : memref<8x128xf32, #tpu.memory_space<vmem>>, vector<1x128xf32>
      tpu.vector_store %arg11[%c0_34, %c0_35], %68 {strides = array<i32>} : memref<8x128xf32, #tpu.memory_space<vmem>>, vector<1x128xf32>,
      %70 = arith.mulf %50, %46 : vector<1x128xf32>
      %71 = arith.addf %51, %70 : vector<1x128xf32>
      %72 = arith.mulf %52, %49 : vector<1x128xf32>
      %73 = arith.subf %71, %72 : vector<1x128xf32>
      %74 = arith.mulf %50, %49 : vector<1x128xf32>
      %75 = arith.addf %53, %74 : vector<1x128xf32>
      %76 = arith.mulf %52, %46 : vector<1x128xf32>
      %77 = arith.addf %75, %76 : vector<1x128xf32>
      %78 = arith.mulf %73, %28 : vector<1x128xf32>
      %79 = arith.mulf %77, %29 : vector<1x128xf32>
      %80 = arith.subf %78, %79 : vector<1x128xf32>
      %c1 = arith.constant 1 : index
      %c0_36 = arith.constant 0 : index
      %81 = vector.load %arg10[%c1, %c0_36] : memref<8x128xf32, #tpu.memory_space<vmem>>, vector<1x128xf32>
      tpu.vector_store %arg10[%c1, %c0_36], %80 {strides = array<i32>} : memref<8x128xf32, #tpu.memory_space<vmem>>, vector<1x128xf32>,
      %82 = arith.mulf %73, %29 : vector<1x128xf32>
      %83 = arith.mulf %77, %28 : vector<1x128xf32>
      %84 = arith.addf %82, %83 : vector<1x128xf32>
      %c1_37 = arith.constant 1 : index
      %c0_38 = arith.constant 0 : index
      %85 = vector.load %arg11[%c1_37, %c0_38] : memref<8x128xf32, #tpu.memory_space<vmem>>, vector<1x128xf32>
      tpu.vector_store %arg11[%c1_37, %c0_38], %84 {strides = array<i32>} : memref<8x128xf32, #tpu.memory_space<vmem>>, vector<1x128xf32>,
      %86 = vector.extract_strided_slice %24 {offsets = [2, 0], sizes = [1, 128], strides = [1, 1]} : vector<8x128xf32> to vector<1x128xf32>
      %87 = vector.extract_strided_slice %24 {offsets = [3, 0], sizes = [1, 128], strides = [1, 1]} : vector<8x128xf32> to vector<1x128xf32>
      %88 = vector.extract_strided_slice %25 {offsets = [2, 0], sizes = [1, 128], strides = [1, 1]} : vector<8x128xf32> to vector<1x128xf32>
      %89 = vector.extract_strided_slice %25 {offsets = [3, 0], sizes = [1, 128], strides = [1, 1]} : vector<8x128xf32> to vector<1x128xf32>
      %90 = arith.mulf %87, %36 : vector<1x128xf32>
      %91 = arith.addf %86, %90 : vector<1x128xf32>
      %92 = arith.mulf %89, %39 : vector<1x128xf32>
      %93 = arith.subf %91, %92 : vector<1x128xf32>
      %94 = arith.mulf %87, %39 : vector<1x128xf32>
      %95 = arith.addf %88, %94 : vector<1x128xf32>
      %96 = arith.mulf %89, %36 : vector<1x128xf32>
      %97 = arith.addf %95, %96 : vector<1x128xf32>
      %98 = arith.mulf %93, %28 : vector<1x128xf32>
      %99 = arith.mulf %97, %29 : vector<1x128xf32>
      %100 = arith.subf %98, %99 : vector<1x128xf32>
      %c2 = arith.constant 2 : index
      %c0_39 = arith.constant 0 : index
      %101 = vector.load %arg10[%c2, %c0_39] : memref<8x128xf32, #tpu.memory_space<vmem>>, vector<1x128xf32>
      tpu.vector_store %arg10[%c2, %c0_39], %100 {strides = array<i32>} : memref<8x128xf32, #tpu.memory_space<vmem>>, vector<1x128xf32>,
      %102 = arith.mulf %93, %29 : vector<1x128xf32>
      %103 = arith.mulf %97, %28 : vector<1x128xf32>
      %104 = arith.addf %102, %103 : vector<1x128xf32>
      %c2_40 = arith.constant 2 : index
      %c0_41 = arith.constant 0 : index
      %105 = vector.load %arg11[%c2_40, %c0_41] : memref<8x128xf32, #tpu.memory_space<vmem>>, vector<1x128xf32>
      tpu.vector_store %arg11[%c2_40, %c0_41], %104 {strides = array<i32>} : memref<8x128xf32, #tpu.memory_space<vmem>>, vector<1x128xf32>,
      %106 = arith.mulf %86, %46 : vector<1x128xf32>
      %107 = arith.addf %87, %106 : vector<1x128xf32>
      %108 = arith.mulf %88, %49 : vector<1x128xf32>
      %109 = arith.subf %107, %108 : vector<1x128xf32>
      %110 = arith.mulf %86, %49 : vector<1x128xf32>
      %111 = arith.addf %89, %110 : vector<1x128xf32>
      %112 = arith.mulf %88, %46 : vector<1x128xf32>
      %113 = arith.addf %111, %112 : vector<1x128xf32>
      %114 = arith.mulf %109, %28 : vector<1x128xf32>
      %115 = arith.mulf %113, %29 : vector<1x128xf32>
      %116 = arith.subf %114, %115 : vector<1x128xf32>
      %c3 = arith.constant 3 : index
      %c0_42 = arith.constant 0 : index
      %117 = vector.load %arg10[%c3, %c0_42] : memref<8x128xf32, #tpu.memory_space<vmem>>, vector<1x128xf32>
      tpu.vector_store %arg10[%c3, %c0_42], %116 {strides = array<i32>} : memref<8x128xf32, #tpu.memory_space<vmem>>, vector<1x128xf32>,
      %118 = arith.mulf %109, %29 : vector<1x128xf32>
      %119 = arith.mulf %113, %28 : vector<1x128xf32>
      %120 = arith.addf %118, %119 : vector<1x128xf32>
      %c3_43 = arith.constant 3 : index
      %c0_44 = arith.constant 0 : index
      %121 = vector.load %arg11[%c3_43, %c0_44] : memref<8x128xf32, #tpu.memory_space<vmem>>, vector<1x128xf32>
      tpu.vector_store %arg11[%c3_43, %c0_44], %120 {strides = array<i32>} : memref<8x128xf32, #tpu.memory_space<vmem>>, vector<1x128xf32>,
    } else {
    }
    return
  }
  func.func @transform_0(%arg0: i32, %arg1: i32) -> (i32, i32) {
    %c0_i32 = arith.constant 0 : i32
    %c0_i32_0 = arith.constant 0 : i32
    return %c0_i32, %arg1 : i32, i32
  }
  func.func @transform_1(%arg0: i32, %arg1: i32) -> (i32, i32) {
    %c0_i32 = arith.constant 0 : i32
    %c0_i32_0 = arith.constant 0 : i32
    return %c0_i32, %arg1 : i32, i32
  }
  func.func @transform_2(%arg0: i32, %arg1: i32) -> (i32, i32) {
    %c0_i32 = arith.constant 0 : i32
    return %arg1, %arg0 : i32, i32
  }
  func.func @transform_3(%arg0: i32, %arg1: i32) -> (i32, i32) {
    %c0_i32 = arith.constant 0 : i32
    return %arg1, %arg0 : i32, i32
  }
  func.func @transform_4(%arg0: i32, %arg1: i32) -> (i32, i32) {
    %c0_i32 = arith.constant 0 : i32
    %c0_i32_0 = arith.constant 0 : i32
    return %c0_i32, %arg0 : i32, i32
  }
  func.func @transform_5(%arg0: i32, %arg1: i32) -> (i32, i32) {
    %c0_i32 = arith.constant 0 : i32
    %c0_i32_0 = arith.constant 0 : i32
    return %c0_i32, %arg0 : i32, i32
  }
  func.func @transform_6(%arg0: i32, %arg1: i32) -> (i32, i32) {
    %c0_i32 = arith.constant 0 : i32
    %c0_i32_0 = arith.constant 0 : i32
    return %c0_i32, %arg0 : i32, i32
  }
  func.func @transform_7(%arg0: i32, %arg1: i32) -> (i32, i32) {
    %c0_i32 = arith.constant 0 : i32
    %c0_i32_0 = arith.constant 0 : i32
    return %c0_i32, %arg0 : i32, i32
  }
  func.func @transform_8(%arg0: i32, %arg1: i32) -> (i32, i32) {
    %c0_i32 = arith.constant 0 : i32
    %c0_i32_0 = arith.constant 0 : i32
    return %c0_i32, %arg0 : i32, i32
  }
  func.func @transform_9(%arg0: i32, %arg1: i32) -> (i32, i32) {
    %c0_i32 = arith.constant 0 : i32
    %c0_i32_0 = arith.constant 0 : i32
    return %c0_i32, %arg0 : i32, i32
  }
}

</mosaic_0001>

<bundles_post_ra>
// kernel: custom-call
= control target key start
LH: loop header
LB: loop body
LE: loop exit
PB: predicated region body
PF: predicated region fallthrough
CT: control target
= control target key end

     0   :  { %2 = vsyncpa [#allocation0], 0  ;;  %s61_s0 = inlined_call_operand.hbm [shape: c64[8,8], index: 0, kind: input, shape index: {}]   ;;  %s62_s1 = inlined_call_operand.vmem [shape: f32[8,8], index: 1, kind: output, shape index: {}]  }
   0x1   :  { %s3_s8 = sshll.u32 %s62_s1, 4  ;;  %s9_s11 = scalar_lea.hbm %s61_s0, 128  ;;  %s4_s8 = int_to_ptr.vmem [resolvable:$true] %s3_s8 }
   0x2   :  { %p10_p0 = scmp.ne.s32.totalorder %s61_s0, %s9_s11  ;;  %s11_s16 = scalar_lea.hbm %s61_s0, 256 }
   0x3   :  { %p12_p1 = scmp.lt.u32.totalorder %s11_s16, %s9_s11  ;;  %p13_p2 = scmp.lt.u32.totalorder %s9_s11, %s61_s0 }
   0x5   :  { %p14_p3 = por %p13_p2, %p12_p1 }
   0x7   :  { %p15_p4 = pnand %p14_p3, %p10_p0 }
   0x9   :  { %18 = shalt.err (!%p15_p4)  }
   0xa   :  { %s19_s1 = scalar_lea.vmem %s4_s8, 128  ;;  %p24_p6 = scmp.lt.s32.totalorder %s4_s8, %s4_s8 }
   0xb   :  { %p20_p5 = scmp.ne.s32.totalorder %s4_s8, %s19_s1  ;;  %p25_p7 = scmp.lt.s32.totalorder %s19_s1, %s19_s1 }
   0xd   :  { %p26_p8 = por %p25_p7, %p24_p6 }
   0xf   :  { %p27_p9 = pnand %p26_p8, %p20_p5 }
  0x11   :  { %30 = shalt.err (!%p27_p9)  }
  0x12   :  { %6 = dma.hbm_to_vmem [thread:$0]  %s61_s0, 128, %s4_s8, [#allocation0] }
  0x13   :  { %31 = dma.done.wait [#allocation0], 128  }
  0x14   :  { %32 = vsyncadd [#allocation0], 4294967168 }
  0x15   :  { %8 = vsyncpa [#allocation0], 1 }

// kernel: custom-call.2
= control target key start
LH: loop header
LB: loop body
LE: loop exit
PB: predicated region body
PF: predicated region fallthrough
CT: control target
= control target key end

     0   :  { %s200_s0 = inlined_call_operand.vmem [shape: c64[2,2,1,4,8,8], index: 0, kind: input, shape index: {}]   ;;  %s201_s1 = inlined_call_operand.vmem [shape: f32[2,2,1,4,8,8], index: 1, kind: output, shape index: {}]  }
   0x1   :  { %v2_v0 = vld [vmem:[%s200_s0] sm:$0xff]  ;;  %v64_v1 = vld [vmem:[%s200_s0 + $0x8] sm:$0xff]  ;;  %v66_v2 = vld [vmem:[%s200_s0 + $0x10] sm:$0xff] }
   0x2   :  { %3 = vst [vmem:[%s201_s1] sm:$0xff] %v2_v0  ;;  %65 = vst [vmem:[%s201_s1 + $0x8] sm:$0xff] %v64_v1  ;;  %v68_v3 = vld [vmem:[%s200_s0 + $0x18] sm:$0xff]  ;;  %v70_v4 = vld [vmem:[%s200_s0 + $0x20] sm:$0xff] }
   0x3   :  { %67 = vst [vmem:[%s201_s1 + $0x10] sm:$0xff] %v66_v2  ;;  %v72_v5 = vld [vmem:[%s200_s0 + $0x28] sm:$0xff]  ;;  %69 = vst [vmem:[%s201_s1 + $0x18] sm:$0xff] %v68_v3  ;;  %v74_v6 = vld [vmem:[%s200_s0 + $0x30] sm:$0xff] }
   0x4   :  { %71 = vst [vmem:[%s201_s1 + $0x20] sm:$0xff] %v70_v4  ;;  %73 = vst [vmem:[%s201_s1 + $0x28] sm:$0xff] %v72_v5  ;;  %v76_v7 = vld [vmem:[%s200_s0 + $0x38] sm:$0xff]  ;;  %v78_v8 = vld [vmem:[%s200_s0 + $0x40] sm:$0xff] }
   0x5   :  { %75 = vst [vmem:[%s201_s1 + $0x30] sm:$0xff] %v74_v6  ;;  %77 = vst [vmem:[%s201_s1 + $0x38] sm:$0xff] %v76_v7  ;;  %v80_v9 = vld [vmem:[%s200_s0 + $0x48] sm:$0xff]  ;;  %v82_v10 = vld [vmem:[%s200_s0 + $0x50] sm:$0xff] }
   0x6   :  { %79 = vst [vmem:[%s201_s1 + $0x40] sm:$0xff] %v78_v8  ;;  %v84_v11 = vld [vmem:[%s200_s0 + $0x58] sm:$0xff]  ;;  %81 = vst [vmem:[%s201_s1 + $0x48] sm:$0xff] %v80_v9  ;;  %v86_v12 = vld [vmem:[%s200_s0 + $0x60] sm:$0xff] }
   0x7   :  { %83 = vst [vmem:[%s201_s1 + $0x50] sm:$0xff] %v82_v10  ;;  %85 = vst [vmem:[%s201_s1 + $0x58] sm:$0xff] %v84_v11  ;;  %v88_v13 = vld [vmem:[%s200_s0 + $0x68] sm:$0xff]  ;;  %v90_v14 = vld [vmem:[%s200_s0 + $0x70] sm:$0xff] }
   0x8   :  { %87 = vst [vmem:[%s201_s1 + $0x60] sm:$0xff] %v86_v12  ;;  %89 = vst [vmem:[%s201_s1 + $0x68] sm:$0xff] %v88_v13  ;;  %v92_v15 = vld [vmem:[%s200_s0 + $0x78] sm:$0xff] }
   0x9   :  { %91 = vst [vmem:[%s201_s1 + $0x70] sm:$0xff] %v90_v14  ;;  %93 = vst [vmem:[%s201_s1 + $0x78] sm:$0xff] %v92_v15 }

// kernel: custom-call.3
= control target key start
LH: loop header
LB: loop body
LE: loop exit
PB: predicated region body
PF: predicated region fallthrough
CT: control target
= control target key end

     0   :  { %s217_s0 = inlined_call_operand.vmem [shape: c64[2,2,1,4,8,8], index: 0, kind: input, shape index: {}]   ;;  %s218_s1 = inlined_call_operand.vmem [shape: f32[2,2,1,4,8,8], index: 1, kind: output, shape index: {}]  }
   0x1   :  { %v80_v0 = vld [vmem:[%s217_s0 + $0x80] sm:$0xff]  ;;  %v81_v1 = vld [vmem:[%s217_s0 + $0x88] sm:$0xff]  ;;  %v83_v2 = vld [vmem:[%s217_s0 + $0x90] sm:$0xff] }
   0x2   :  { %4 = vst [vmem:[%s218_s1] sm:$0xff] %v80_v0  ;;  %82 = vst [vmem:[%s218_s1 + $0x8] sm:$0xff] %v81_v1  ;;  %v85_v3 = vld [vmem:[%s217_s0 + $0x98] sm:$0xff]  ;;  %v87_v4 = vld [vmem:[%s217_s0 + $0xa0] sm:$0xff] }
   0x3   :  { %84 = vst [vmem:[%s218_s1 + $0x10] sm:$0xff] %v83_v2  ;;  %v89_v5 = vld [vmem:[%s217_s0 + $0xa8] sm:$0xff]  ;;  %86 = vst [vmem:[%s218_s1 + $0x18] sm:$0xff] %v85_v3  ;;  %v91_v6 = vld [vmem:[%s217_s0 + $0xb0] sm:$0xff] }
   0x4   :  { %88 = vst [vmem:[%s218_s1 + $0x20] sm:$0xff] %v87_v4  ;;  %90 = vst [vmem:[%s218_s1 + $0x28] sm:$0xff] %v89_v5  ;;  %v93_v7 = vld [vmem:[%s217_s0 + $0xb8] sm:$0xff]  ;;  %v95_v8 = vld [vmem:[%s217_s0 + $0xc0] sm:$0xff] }
   0x5   :  { %92 = vst [vmem:[%s218_s1 + $0x30] sm:$0xff] %v91_v6  ;;  %94 = vst [vmem:[%s218_s1 + $0x38] sm:$0xff] %v93_v7  ;;  %v97_v9 = vld [vmem:[%s217_s0 + $0xc8] sm:$0xff]  ;;  %v99_v10 = vld [vmem:[%s217_s0 + $0xd0] sm:$0xff] }
   0x6   :  { %96 = vst [vmem:[%s218_s1 + $0x40] sm:$0xff] %v95_v8  ;;  %v101_v11 = vld [vmem:[%s217_s0 + $0xd8] sm:$0xff]  ;;  %98 = vst [vmem:[%s218_s1 + $0x48] sm:$0xff] %v97_v9  ;;  %v103_v12 = vld [vmem:[%s217_s0 + $0xe0] sm:$0xff] }
   0x7   :  { %100 = vst [vmem:[%s218_s1 + $0x50] sm:$0xff] %v99_v10  ;;  %102 = vst [vmem:[%s218_s1 + $0x58] sm:$0xff] %v101_v11  ;;  %v105_v13 = vld [vmem:[%s217_s0 + $0xe8] sm:$0xff]  ;;  %v107_v14 = vld [vmem:[%s217_s0 + $0xf0] sm:$0xff] }
   0x8   :  { %104 = vst [vmem:[%s218_s1 + $0x60] sm:$0xff] %v103_v12  ;;  %106 = vst [vmem:[%s218_s1 + $0x68] sm:$0xff] %v105_v13  ;;  %v109_v15 = vld [vmem:[%s217_s0 + $0xf8] sm:$0xff] }
   0x9   :  { %108 = vst [vmem:[%s218_s1 + $0x70] sm:$0xff] %v107_v14  ;;  %110 = vst [vmem:[%s218_s1 + $0x78] sm:$0xff] %v109_v15 }

// kernel: custom-call.1
= control target key start
LH: loop header
LB: loop body
LE: loop exit
PB: predicated region body
PF: predicated region fallthrough
CT: control target
= control target key end

     0   :  { %s59_s0 = inlined_call_operand.hbm [shape: c64[8,8], index: 0, kind: input, shape index: {}]   ;;  %s60_s1 = inlined_call_operand.vmem [shape: f32[8,8], index: 1, kind: output, shape index: {}]  }
   0x1   :  { %s2_s8 = scalar_lea.hbm %s59_s0, 128 }
   0x2   :  { %3 = vsyncpa [#allocation0], 0  ;;  %s4_s11 = sshll.u32 %s60_s1, 4  ;;  %s34_s14 = scalar_lea.hbm %s59_s0, 256  ;;  %s5_s11 = int_to_ptr.vmem [resolvable:$true] %s4_s11 }
   0x3   :  { %p11_p0 = scmp.ne.s32.totalorder %s2_s8, %s34_s14  ;;  %p13_p1 = scmp.lt.u32.totalorder %s2_s8, %s59_s0 }
   0x4   :  { %p14_p2 = scmp.lt.u32.totalorder %s34_s14, %s34_s14  ;;  %p16_p4 = scmp.lt.u32.totalorder %s34_s14, %s2_s8 }
   0x6   :  { %p15_p3 = por %p14_p2, %p13_p1 }
   0x8   :  { %p17_p5 = por %p16_p4, %p15_p3 }
   0xa   :  { %p18_p6 = pnand %p17_p5, %p11_p0 }
   0xc   :  { %21 = shalt.err (!%p18_p6)  }
   0xd   :  { %s22_s17 = scalar_lea.vmem %s5_s11, 128  ;;  %p27_p8 = scmp.lt.s32.totalorder %s5_s11, %s5_s11 }
   0xe   :  { %p23_p7 = scmp.ne.s32.totalorder %s5_s11, %s22_s17  ;;  %p28_p9 = scmp.lt.s32.totalorder %s22_s17, %s22_s17 }
  0x10   :  { %p29_p10 = por %p28_p9, %p27_p8 }
  0x12   :  { %p30_p11 = pnand %p29_p10, %p23_p7 }
  0x14   :  { %33 = shalt.err (!%p30_p11)  }
  0x15   :  { %7 = dma.hbm_to_vmem [thread:$0]  %s2_s8, 128, %s5_s11, [#allocation0] }
  0x16   :  { %35 = dma.done.wait [#allocation0], 128  }
  0x17   :  { %36 = vsyncadd [#allocation0], 4294967168 }
  0x18   :  { %9 = vsyncpa [#allocation0], 1 }

// kernel: custom-call.4
= control target key start
LH: loop header
LB: loop body
LE: loop exit
PB: predicated region body
PF: predicated region fallthrough
CT: control target
= control target key end

     0   :  { %2 = vsyncpa [#allocation0], 0  ;;  %s61_s0 = inlined_call_operand.hbm [shape: c64[2,192], index: 0, kind: input, shape index: {}]   ;;  %s62_s1 = inlined_call_operand.vmem [shape: f32[2,192], index: 1, kind: output, shape index: {}]  }
   0x1   :  { %s3_s8 = sshll.u32 %s62_s1, 4  ;;  %s9_s11 = scalar_lea.hbm %s61_s0, 64  ;;  %s4_s8 = int_to_ptr.vmem [resolvable:$true] %s3_s8 }
   0x2   :  { %p10_p0 = scmp.ne.s32.totalorder %s61_s0, %s9_s11  ;;  %s11_s16 = scalar_lea.hbm %s61_s0, 128 }
   0x3   :  { %p12_p1 = scmp.lt.u32.totalorder %s11_s16, %s9_s11  ;;  %p13_p2 = scmp.lt.u32.totalorder %s9_s11, %s61_s0 }
   0x5   :  { %p14_p3 = por %p13_p2, %p12_p1 }
   0x7   :  { %p15_p4 = pnand %p14_p3, %p10_p0 }
   0x9   :  { %18 = shalt.err (!%p15_p4)  }
   0xa   :  { %s19_s1 = scalar_lea.vmem %s4_s8, 64  ;;  %p24_p6 = scmp.lt.s32.totalorder %s4_s8, %s4_s8 }
   0xb   :  { %p20_p5 = scmp.ne.s32.totalorder %s4_s8, %s19_s1  ;;  %p25_p7 = scmp.lt.s32.totalorder %s19_s1, %s19_s1 }
   0xd   :  { %p26_p8 = por %p25_p7, %p24_p6 }
   0xf   :  { %p27_p9 = pnand %p26_p8, %p20_p5 }
  0x11   :  { %30 = shalt.err (!%p27_p9)  }
  0x12   :  { %6 = dma.hbm_to_vmem [thread:$0]  %s61_s0, 64, %s4_s8, [#allocation0] }
  0x13   :  { %31 = dma.done.wait [#allocation0], 64  }
  0x14   :  { %32 = vsyncadd [#allocation0], 4294967232 }
  0x15   :  { %8 = vsyncpa [#allocation0], 1 }

// kernel: custom-call.5
= control target key start
LH: loop header
LB: loop body
LE: loop exit
PB: predicated region body
PF: predicated region fallthrough
CT: control target
= control target key end

     0   :  { %s59_s0 = inlined_call_operand.hbm [shape: c64[2,192], index: 0, kind: input, shape index: {}]   ;;  %s60_s1 = inlined_call_operand.vmem [shape: f32[2,192], index: 1, kind: output, shape index: {}]  }
   0x1   :  { %s2_s8 = scalar_lea.hbm %s59_s0, 64 }
   0x2   :  { %3 = vsyncpa [#allocation0], 0  ;;  %s4_s11 = sshll.u32 %s60_s1, 4  ;;  %s34_s14 = scalar_lea.hbm %s59_s0, 128  ;;  %s5_s11 = int_to_ptr.vmem [resolvable:$true] %s4_s11 }
   0x3   :  { %p11_p0 = scmp.ne.s32.totalorder %s2_s8, %s34_s14  ;;  %p13_p1 = scmp.lt.u32.totalorder %s2_s8, %s59_s0 }
   0x4   :  { %p14_p2 = scmp.lt.u32.totalorder %s34_s14, %s34_s14  ;;  %p16_p4 = scmp.lt.u32.totalorder %s34_s14, %s2_s8 }
   0x6   :  { %p15_p3 = por %p14_p2, %p13_p1 }
   0x8   :  { %p17_p5 = por %p16_p4, %p15_p3 }
   0xa   :  { %p18_p6 = pnand %p17_p5, %p11_p0 }
   0xc   :  { %21 = shalt.err (!%p18_p6)  }
   0xd   :  { %s22_s17 = scalar_lea.vmem %s5_s11, 64  ;;  %p27_p8 = scmp.lt.s32.totalorder %s5_s11, %s5_s11 }
   0xe   :  { %p23_p7 = scmp.ne.s32.totalorder %s5_s11, %s22_s17  ;;  %p28_p9 = scmp.lt.s32.totalorder %s22_s17, %s22_s17 }
  0x10   :  { %p29_p10 = por %p28_p9, %p27_p8 }
  0x12   :  { %p30_p11 = pnand %p29_p10, %p23_p7 }
  0x14   :  { %33 = shalt.err (!%p30_p11)  }
  0x15   :  { %7 = dma.hbm_to_vmem [thread:$0]  %s2_s8, 64, %s5_s11, [#allocation0] }
  0x16   :  { %35 = dma.done.wait [#allocation0], 64  }
  0x17   :  { %36 = vsyncadd [#allocation0], 4294967232 }
  0x18   :  { %9 = vsyncpa [#allocation0], 1 }

// kernel: custom-call.6
= control target key start
LH: loop header
LB: loop body
LE: loop exit
PB: predicated region body
PF: predicated region fallthrough
CT: control target
= control target key end

     0   :  { %2 = vsyncpa [#allocation0], 0  ;;  %s61_s0 = inlined_call_operand.hbm [shape: c64[192], index: 0, kind: input, shape index: {}]   ;;  %s62_s1 = inlined_call_operand.vmem [shape: f32[192], index: 1, kind: output, shape index: {}]  }
   0x1   :  { %s3_s8 = sshll.u32 %s62_s1, 4  ;;  %s9_s11 = scalar_lea.hbm %s61_s0, 32  ;;  %s4_s8 = int_to_ptr.vmem [resolvable:$true] %s3_s8 }
   0x2   :  { %p10_p0 = scmp.ne.s32.totalorder %s61_s0, %s9_s11  ;;  %s11_s16 = scalar_lea.hbm %s61_s0, 64 }
   0x3   :  { %p12_p1 = scmp.lt.u32.totalorder %s11_s16, %s9_s11  ;;  %p13_p2 = scmp.lt.u32.totalorder %s9_s11, %s61_s0 }
   0x5   :  { %p14_p3 = por %p13_p2, %p12_p1 }
   0x7   :  { %p15_p4 = pnand %p14_p3, %p10_p0 }
   0x9   :  { %18 = shalt.err (!%p15_p4)  }
   0xa   :  { %s19_s1 = scalar_lea.vmem %s4_s8, 32  ;;  %p24_p6 = scmp.lt.s32.totalorder %s4_s8, %s4_s8 }
   0xb   :  { %p20_p5 = scmp.ne.s32.totalorder %s4_s8, %s19_s1  ;;  %p25_p7 = scmp.lt.s32.totalorder %s19_s1, %s19_s1 }
   0xd   :  { %p26_p8 = por %p25_p7, %p24_p6 }
   0xf   :  { %p27_p9 = pnand %p26_p8, %p20_p5 }
  0x11   :  { %30 = shalt.err (!%p27_p9)  }
  0x12   :  { %6 = dma.hbm_to_vmem [thread:$0]  %s61_s0, 32, %s4_s8, [#allocation0] }
  0x13   :  { %31 = dma.done.wait [#allocation0], 32  }
  0x14   :  { %32 = vsyncadd [#allocation0], 4294967264 }
  0x15   :  { %8 = vsyncpa [#allocation0], 1 }

// kernel: custom-call.7
= control target key start
LH: loop header
LB: loop body
LE: loop exit
PB: predicated region body
PF: predicated region fallthrough
CT: control target
= control target key end

     0   :  { %s59_s0 = inlined_call_operand.hbm [shape: c64[192], index: 0, kind: input, shape index: {}]   ;;  %s60_s1 = inlined_call_operand.vmem [shape: f32[192], index: 1, kind: output, shape index: {}]  }
   0x1   :  { %s2_s8 = scalar_lea.hbm %s59_s0, 32 }
   0x2   :  { %3 = vsyncpa [#allocation0], 0  ;;  %s4_s11 = sshll.u32 %s60_s1, 4  ;;  %s34_s14 = scalar_lea.hbm %s59_s0, 64  ;;  %s5_s11 = int_to_ptr.vmem [resolvable:$true] %s4_s11 }
   0x3   :  { %p11_p0 = scmp.ne.s32.totalorder %s2_s8, %s34_s14  ;;  %p13_p1 = scmp.lt.u32.totalorder %s2_s8, %s59_s0 }
   0x4   :  { %p14_p2 = scmp.lt.u32.totalorder %s34_s14, %s34_s14  ;;  %p16_p4 = scmp.lt.u32.totalorder %s34_s14, %s2_s8 }
   0x6   :  { %p15_p3 = por %p14_p2, %p13_p1 }
   0x8   :  { %p17_p5 = por %p16_p4, %p15_p3 }
   0xa   :  { %p18_p6 = pnand %p17_p5, %p11_p0 }
   0xc   :  { %21 = shalt.err (!%p18_p6)  }
   0xd   :  { %s22_s17 = scalar_lea.vmem %s5_s11, 32  ;;  %p27_p8 = scmp.lt.s32.totalorder %s5_s11, %s5_s11 }
   0xe   :  { %p23_p7 = scmp.ne.s32.totalorder %s5_s11, %s22_s17  ;;  %p28_p9 = scmp.lt.s32.totalorder %s22_s17, %s22_s17 }
  0x10   :  { %p29_p10 = por %p28_p9, %p27_p8 }
  0x12   :  { %p30_p11 = pnand %p29_p10, %p23_p7 }
  0x14   :  { %33 = shalt.err (!%p30_p11)  }
  0x15   :  { %7 = dma.hbm_to_vmem [thread:$0]  %s2_s8, 32, %s5_s11, [#allocation0] }
  0x16   :  { %35 = dma.done.wait [#allocation0], 32  }
  0x17   :  { %36 = vsyncadd [#allocation0], 4294967264 }
  0x18   :  { %9 = vsyncpa [#allocation0], 1 }

// kernel: custom-call.8
= control target key start
LH: loop header
LB: loop body
LE: loop exit
PB: predicated region body
PF: predicated region fallthrough
CT: control target
= control target key end

     0   :  { %s126_s0 = inlined_call_operand.vmem [shape: f32[2,2,192,1], index: 0, kind: input, shape index: {}]   ;;  %s127_s1 = inlined_call_operand.vmem [shape: f32[2,2,192,1], index: 1, kind: input, shape index: {}]   ;;  %s128_s2 = inlined_call_operand.hbm [shape: c64[2,2,192,1], index: 2, kind: output, shape index: {}]  }
   0x1   :  { %s87_s11 = scalar_lea.hbm %s128_s2, 128 }
   0x2   :  { %4 = vsyncpa [#allocation0], 0  ;;  %s5_s14 = sshll.u32 %s126_s0, 4  ;;  %s6_s14 = int_to_ptr.vmem [resolvable:$true] %s5_s14 }
   0x3   :  { %s18_s15 = scalar_lea.vmem %s6_s14, 128  ;;  %p23_p1 = scmp.lt.s32.totalorder %s6_s14, %s6_s14 }
   0x4   :  { %p19_p0 = scmp.ne.s32.totalorder %s6_s14, %s18_s15  ;;  %p24_p2 = scmp.lt.s32.totalorder %s18_s15, %s18_s15 }
   0x6   :  { %p25_p3 = por %p24_p2, %p23_p1 }
   0x8   :  { %p26_p4 = pnand %p25_p3, %p19_p0 }
   0xa   :  { %29 = shalt.err (!%p26_p4)  }
   0xb   :  { %p31_p5 = scmp.ne.s32.totalorder %s128_s2, %s87_s11  ;;  %s32_s0 = scalar_lea.hbm %s128_s2, 256 }
   0xc   :  { %p33_p6 = scmp.lt.u32.totalorder %s32_s0, %s87_s11  ;;  %p34_p7 = scmp.lt.u32.totalorder %s87_s11, %s128_s2 }
   0xe   :  { %p35_p8 = por %p34_p7, %p33_p6 }
  0x10   :  { %p36_p9 = pnand %p35_p8, %p31_p5 }
  0x12   :  { %39 = shalt.err (!%p36_p9)  }
  0x13   :  { %8 = dma.vmem_to_hbm [thread:$0]  %s6_s14, 128, %s128_s2, [#allocation0] }
  0x14   :  { %65 = dma.done.wait [#allocation0], 128  }
  0x15   :  { %66 = vsyncadd [#allocation0], 4294967168 }
  0x16   :  { %10 = vsyncpa [#allocation0], 1 }
  0x17   :  { %11 = vsyncpa [#allocation1], 0  ;;  %s12_s28 = sshll.u32 %s127_s1, 4  ;;  %s13_s28 = int_to_ptr.vmem [resolvable:$true] %s12_s28 }
  0x18   :  { %s40_s29 = scalar_lea.vmem %s13_s28, 128  ;;  %p45_p11 = scmp.lt.s32.totalorder %s13_s28, %s13_s28 }
  0x19   :  { %p41_p10 = scmp.ne.s32.totalorder %s13_s28, %s40_s29  ;;  %p46_p12 = scmp.lt.s32.totalorder %s40_s29, %s40_s29 }
  0x1b   :  { %p47_p13 = por %p46_p12, %p45_p11 }
  0x1d   :  { %p48_p0 = pnand %p47_p13, %p41_p10 }
  0x1f   :  { %51 = shalt.err (!%p48_p0)  }
  0x20   :  { %p53_p1 = scmp.ne.s32.totalorder %s87_s11, %s32_s0  ;;  %p56_p2 = scmp.lt.u32.totalorder %s32_s0, %s32_s0 }
  0x22   :  { %p57_p3 = por %p56_p2, %p34_p7 }
  0x24   :  { %p59_p4 = por %p57_p3, %p33_p6 }
  0x26   :  { %p60_p5 = pnand %p59_p4, %p53_p1 }
  0x28   :  { %63 = shalt.err (!%p60_p5)  }
  0x29   :  { %15 = dma.vmem_to_hbm [thread:$0]  %s13_s28, 128, %s87_s11, [#allocation1] }
  0x2a   :  { %67 = dma.done.wait [#allocation1], 128  }
  0x2b   :  { %68 = vsyncadd [#allocation1], 4294967168 }
  0x2c   :  { %17 = vsyncpa [#allocation1], 1 }

// kernel: low_rank_nufft_forward.1
= control target key start
LH: loop header
LB: loop body
LE: loop exit
PB: predicated region body
PF: predicated region fallthrough
CT: control target
= control target key end

     0   :  { %s3799_s0 = inlined_call_operand.vmem [shape: f32[8,1152], index: 0, kind: input, shape index: {}]   ;;  %s3800_s1 = inlined_call_operand.vmem [shape: f32[8,1152], index: 1, kind: input, shape index: {}]   ;;  %s3801_s2 = inlined_call_operand.vmem [shape: bf16[1152,256], index: 2, kind: input, shape index: {}]   ;;  %s3802_s3 = inlined_call_operand.vmem [shape: bf16[1152,256], index: 3, kind: input, shape index: {}]   ;;  %s3803_s4 = inlined_call_operand.vmem [shape: f32[2,256], index: 4, kind: input, shape index: {}]   ;;  %s3804_s5 = inlined_call_operand.vmem [shape: f32[2,256], index: 5, kind: input, shape index: {}]   ;;  %s3805_s6 = inlined_call_operand.vmem [shape: f32[1,256], index: 6, kind: input, shape index: {}]   ;;  %s3806_s7 = inlined_call_operand.vmem [shape: f32[1,256], index: 7, kind: input, shape index: {}]   ;;  %s3807_s8 = inlined_call_operand.vmem [shape: f32[8,256], index: 8, kind: output, shape index: {0}]   ;;  %s3808_s9 = inlined_call_operand.vmem [shape: f32[8,256], index: 9, kind: output, shape index: {1}]  }
   0x1   :  { %3812 = sst [smem:[#allocation7_spill]] %s3799_s0 }
   0x2   :  { %3813 = sst [smem:[#allocation8_spill]] %s3800_s1 }
   0x3   :  { %3814 = sst [smem:[#allocation9_spill]] %s3801_s2 }
   0x4   :  { %3815 = sst [smem:[#allocation10_spill]] %s3802_s3 }
   0x5   :  { %s3076_s30 = smov 0   ;;  %s3078_s10 = smov 0  }
   0x6   :  { %s3080_s11 = smov 0   ;;  %s3082_s12 = smov 0  }
   0x7   :  { %s3084_s13 = smov 0   ;;  %s3086_s14 = smov 0  }
   0x8   :  { %s3088_s15 = smov 0  }
   0x9 LB: > { %3816 = sst [smem:[#allocation4_spill]] %s3016_s14  ;;  %s29_s16 = sadd.s32 1, %s3012_s13  ;;  %s3020_s15 = sphi %s3088_s15, %s20_s15   ;;  %s3016_s14 = sphi %s3086_s14, %s3827_s14   ;;  %s3012_s13 = sphi %s3084_s13, %s3831_s13   ;;  %s3008_s12 = sphi %s3082_s12, %s3825_s12   ;;  %s3004_s11 = sphi %s3080_s11, %s3830_s11   ;;  %s3000_s10 = sphi %s3078_s10, %s3829_s10   ;;  %s2996_s30 = sphi %s3076_s30, %s3828_s30  }
   0xa   : > { %p30_p0 = scmp.ge.s32.totalorder %s29_s16, 3  ;;  %s32_s17 = sadd.s32 1, %s3016_s14 }
   0xb   : > { %p100_p1 = scmp.ne.s32.totalorder %s3000_s10, %s2996_s30  ;;  %p101_p2 = scmp.eq.s32.totalorder %s3020_s15, 0 }
   0xc   : > { %s3833_s16 = smov (%p30_p0, %s29_s16), 0  ;;  %s3835_s17 = smov (!%p30_p0, %s32_s17), %s3016_s14 }
   0xd   : > { %3817 = sst [smem:[#allocation5_spill]] %s3833_s16  ;;  %p3119_p3 = por %p101_p2, %p100_p1 }
   0xe   : > { %p34_p4 = scmp.ge.s32.totalorder %s3835_s17, 2  ;;  %s88_s19 = ssub.s32 %s3012_s13, %s3833_s16 }
   0xf   : > { %s93_s22 = sadd.s32 1, %s3000_s10  ;;  %p2075_p6 = scmp.ge.s32.totalorder %s3020_s15, 6 }
  0x10   : > { %s3837_s17 = smov (%p34_p4, %s3835_s17), 0 }
  0x11   : > { %3819 = sst [smem:[#allocation6_spill]] %s3837_s17  ;;  %s89_s20 = ssub.s32 %s3016_s14, %s3837_s17 }
  0x12   : > { %s90_s21 = sor.u32 %s89_s20, %s88_s19  ;;  %310 = sbr.rel (%p2075_p6) target bundleno = 107 (0x6b), region = 16 }
  0x13   : > { %p91_p5 = scmp.eq.s32.totalorder %s90_s21, 0 }
  0x15   : > { %s3131_s23 = scalar_select %p91_p5, %s3000_s10, %s93_s22  }
  0x19   : > { %331 = sbr.rel (!%p3119_p3) target bundleno = 66 (0x42), region = 28  ;;  %s333_s24 = sand.u32 (%p3119_p3), 1, %s3000_s10  }
  0x1a   : > { %s2091_s25 = smul.u32 (%p3119_p3), 96, %s3012_s13  ;;  %s3820_s2 = sld [smem:[#allocation9_spill]] (%p3119_p3) }
  0x1b   : > { %s2903_s26 = smul.u32 (%p3119_p3), 192, %s333_s24 }
  0x1c   : > { %s338_s27 = sadd.s32 (%p3119_p3), %s3016_s14, %s2091_s25 }
  0x1d   : > { %s2077_s28 = sshll.u32 (%p3119_p3), %s338_s27, 2  ;;  %s3147_s21 = scalar_lea.vmem (%p3119_p3), [#allocation2], %s2903_s26 }
  0x20   : > { %s3142_s20 = scalar_lea.vmem %s3820_s2, %s2077_s28 }
  0x21   : > { %v356_v0 = vld [vmem:[%s3142_s20] sm:$0xf]  ;;  %v358_v1 = vld [vmem:[%s3142_s20 + $0x8] sm:$0xf]  ;;  %v360_v2 = vld [vmem:[%s3142_s20 + $0x10] sm:$0xf] }
  0x22   : > { %357 = vst [vmem:[%s3147_s21] sm:$0xf] %v356_v0  ;;  %359 = vst [vmem:[%s3147_s21 + $0x4] sm:$0xf] %v358_v1  ;;  %v362_v3 = vld [vmem:[%s3142_s20 + $0x18] sm:$0xf] }
  0x23   : > { %361 = vst [vmem:[%s3147_s21 + $0x8] sm:$0xf] %v360_v2  ;;  %v364_v4 = vld [vmem:[%s3142_s20 + $0x20] sm:$0xf]  ;;  %v366_v5 = vld [vmem:[%s3142_s20 + $0x28] sm:$0xf] }
  0x24   : > { %363 = vst [vmem:[%s3147_s21 + $0xc] sm:$0xf] %v362_v3  ;;  %365 = vst [vmem:[%s3147_s21 + $0x10] sm:$0xf] %v364_v4  ;;  %v368_v6 = vld [vmem:[%s3142_s20 + $0x30] sm:$0xf] }
  0x25   : > { %367 = vst [vmem:[%s3147_s21 + $0x14] sm:$0xf] %v366_v5  ;;  %v370_v7 = vld [vmem:[%s3142_s20 + $0x38] sm:$0xf]  ;;  %v372_v8 = vld [vmem:[%s3142_s20 + $0x40] sm:$0xf] }
  0x26   : > { %369 = vst [vmem:[%s3147_s21 + $0x18] sm:$0xf] %v368_v6  ;;  %371 = vst [vmem:[%s3147_s21 + $0x1c] sm:$0xf] %v370_v7  ;;  %v374_v9 = vld [vmem:[%s3142_s20 + $0x48] sm:$0xf] }
  0x27   : > { %373 = vst [vmem:[%s3147_s21 + $0x20] sm:$0xf] %v372_v8  ;;  %v376_v10 = vld [vmem:[%s3142_s20 + $0x50] sm:$0xf]  ;;  %v378_v11 = vld [vmem:[%s3142_s20 + $0x58] sm:$0xf] }
  0x28   : > { %375 = vst [vmem:[%s3147_s21 + $0x24] sm:$0xf] %v374_v9  ;;  %377 = vst [vmem:[%s3147_s21 + $0x28] sm:$0xf] %v376_v10  ;;  %v380_v12 = vld [vmem:[%s3142_s20 + $0x60] sm:$0xf] }
  0x29   : > { %379 = vst [vmem:[%s3147_s21 + $0x2c] sm:$0xf] %v378_v11  ;;  %v382_v13 = vld [vmem:[%s3142_s20 + $0x68] sm:$0xf]  ;;  %v384_v14 = vld [vmem:[%s3142_s20 + $0x70] sm:$0xf] }
  0x2a   : > { %381 = vst [vmem:[%s3147_s21 + $0x30] sm:$0xf] %v380_v12  ;;  %383 = vst [vmem:[%s3147_s21 + $0x34] sm:$0xf] %v382_v13  ;;  %v386_v15 = vld [vmem:[%s3142_s20 + $0x78] sm:$0xf] }
  0x2b   : > { %385 = vst [vmem:[%s3147_s21 + $0x38] sm:$0xf] %v384_v14  ;;  %v388_v16 = vld [vmem:[%s3142_s20 + $0x80] sm:$0xf]  ;;  %v390_v17 = vld [vmem:[%s3142_s20 + $0x88] sm:$0xf] }
  0x2c   : > { %387 = vst [vmem:[%s3147_s21 + $0x3c] sm:$0xf] %v386_v15  ;;  %389 = vst [vmem:[%s3147_s21 + $0x40] sm:$0xf] %v388_v16  ;;  %v392_v18 = vld [vmem:[%s3142_s20 + $0x90] sm:$0xf] }
  0x2d   : > { %391 = vst [vmem:[%s3147_s21 + $0x44] sm:$0xf] %v390_v17  ;;  %v394_v19 = vld [vmem:[%s3142_s20 + $0x98] sm:$0xf]  ;;  %v396_v20 = vld [vmem:[%s3142_s20 + $0xa0] sm:$0xf] }
  0x2e   : > { %393 = vst [vmem:[%s3147_s21 + $0x48] sm:$0xf] %v392_v18  ;;  %395 = vst [vmem:[%s3147_s21 + $0x4c] sm:$0xf] %v394_v19  ;;  %v398_v21 = vld [vmem:[%s3142_s20 + $0xa8] sm:$0xf] }
  0x2f   : > { %397 = vst [vmem:[%s3147_s21 + $0x50] sm:$0xf] %v396_v20  ;;  %v400_v22 = vld [vmem:[%s3142_s20 + $0xb0] sm:$0xf]  ;;  %v402_v23 = vld [vmem:[%s3142_s20 + $0xb8] sm:$0xf] }
  0x30   : > { %399 = vst [vmem:[%s3147_s21 + $0x54] sm:$0xf] %v398_v21  ;;  %401 = vst [vmem:[%s3147_s21 + $0x58] sm:$0xf] %v400_v22  ;;  %v404_v24 = vld [vmem:[%s3142_s20 + $0xc0] sm:$0xf] }
  0x31   : > { %403 = vst [vmem:[%s3147_s21 + $0x5c] sm:$0xf] %v402_v23  ;;  %v406_v25 = vld [vmem:[%s3142_s20 + $0xc8] sm:$0xf]  ;;  %v408_v26 = vld [vmem:[%s3142_s20 + $0xd0] sm:$0xf] }
  0x32   : > { %405 = vst [vmem:[%s3147_s21 + $0x60] sm:$0xf] %v404_v24  ;;  %407 = vst [vmem:[%s3147_s21 + $0x64] sm:$0xf] %v406_v25  ;;  %v410_v27 = vld [vmem:[%s3142_s20 + $0xd8] sm:$0xf] }
  0x33   : > { %409 = vst [vmem:[%s3147_s21 + $0x68] sm:$0xf] %v408_v26  ;;  %v412_v28 = vld [vmem:[%s3142_s20 + $0xe0] sm:$0xf]  ;;  %v414_v29 = vld [vmem:[%s3142_s20 + $0xe8] sm:$0xf] }
  0x34   : > { %411 = vst [vmem:[%s3147_s21 + $0x6c] sm:$0xf] %v410_v27  ;;  %413 = vst [vmem:[%s3147_s21 + $0x70] sm:$0xf] %v412_v28  ;;  %v416_v30 = vld [vmem:[%s3142_s20 + $0xf0] sm:$0xf] }
  0x35   : > { %415 = vst [vmem:[%s3147_s21 + $0x74] sm:$0xf] %v414_v29  ;;  %v418_v31 = vld [vmem:[%s3142_s20 + $0xf8] sm:$0xf]  ;;  %v420_v32 = vld [vmem:[%s3142_s20 + $0x100] sm:$0xf] }
  0x36   : > { %417 = vst [vmem:[%s3147_s21 + $0x78] sm:$0xf] %v416_v30  ;;  %419 = vst [vmem:[%s3147_s21 + $0x7c] sm:$0xf] %v418_v31  ;;  %v422_v33 = vld [vmem:[%s3142_s20 + $0x108] sm:$0xf] }
  0x37   : > { %421 = vst [vmem:[%s3147_s21 + $0x80] sm:$0xf] %v420_v32  ;;  %v424_v34 = vld [vmem:[%s3142_s20 + $0x110] sm:$0xf]  ;;  %v426_v35 = vld [vmem:[%s3142_s20 + $0x118] sm:$0xf] }
  0x38   : > { %423 = vst [vmem:[%s3147_s21 + $0x84] sm:$0xf] %v422_v33  ;;  %425 = vst [vmem:[%s3147_s21 + $0x88] sm:$0xf] %v424_v34  ;;  %v428_v36 = vld [vmem:[%s3142_s20 + $0x120] sm:$0xf] }
  0x39   : > { %427 = vst [vmem:[%s3147_s21 + $0x8c] sm:$0xf] %v426_v35  ;;  %v430_v37 = vld [vmem:[%s3142_s20 + $0x128] sm:$0xf]  ;;  %v432_v38 = vld [vmem:[%s3142_s20 + $0x130] sm:$0xf] }
  0x3a   : > { %429 = vst [vmem:[%s3147_s21 + $0x90] sm:$0xf] %v428_v36  ;;  %431 = vst [vmem:[%s3147_s21 + $0x94] sm:$0xf] %v430_v37  ;;  %v434_v39 = vld [vmem:[%s3142_s20 + $0x138] sm:$0xf] }
  0x3b   : > { %433 = vst [vmem:[%s3147_s21 + $0x98] sm:$0xf] %v432_v38  ;;  %v436_v40 = vld [vmem:[%s3142_s20 + $0x140] sm:$0xf]  ;;  %v438_v41 = vld [vmem:[%s3142_s20 + $0x148] sm:$0xf] }
  0x3c   : > { %435 = vst [vmem:[%s3147_s21 + $0x9c] sm:$0xf] %v434_v39  ;;  %437 = vst [vmem:[%s3147_s21 + $0xa0] sm:$0xf] %v436_v40  ;;  %v440_v42 = vld [vmem:[%s3142_s20 + $0x150] sm:$0xf] }
  0x3d   : > { %439 = vst [vmem:[%s3147_s21 + $0xa4] sm:$0xf] %v438_v41  ;;  %v442_v43 = vld [vmem:[%s3142_s20 + $0x158] sm:$0xf]  ;;  %v444_v44 = vld [vmem:[%s3142_s20 + $0x160] sm:$0xf] }
  0x3e   : > { %441 = vst [vmem:[%s3147_s21 + $0xa8] sm:$0xf] %v440_v42  ;;  %443 = vst [vmem:[%s3147_s21 + $0xac] sm:$0xf] %v442_v43  ;;  %v446_v45 = vld [vmem:[%s3142_s20 + $0x168] sm:$0xf] }
  0x3f   : > { %445 = vst [vmem:[%s3147_s21 + $0xb0] sm:$0xf] %v444_v44  ;;  %v448_v46 = vld [vmem:[%s3142_s20 + $0x170] sm:$0xf]  ;;  %v450_v47 = vld [vmem:[%s3142_s20 + $0x178] sm:$0xf] }
  0x40   : > { %447 = vst [vmem:[%s3147_s21 + $0xb4] sm:$0xf] %v446_v45  ;;  %449 = vst [vmem:[%s3147_s21 + $0xb8] sm:$0xf] %v448_v46 }
  0x41   : > { %451 = vst [vmem:[%s3147_s21 + $0xbc] sm:$0xf] %v450_v47 }
  0x42 PF: > { %570 = sbr.rel (!%p3119_p3) target bundleno = 107 (0x6b), region = 69  ;;  %s572_s22 = sand.u32 (%p3119_p3), 1, %s3000_s10  }
  0x43   : > { %s2092_s24 = smul.u32 (%p3119_p3), 96, %s3012_s13  ;;  %s3821_s3 = sld [smem:[#allocation10_spill]] (%p3119_p3) }
  0x44   : > { %s2904_s25 = smul.u32 (%p3119_p3), 192, %s572_s22 }
  0x45   : > { %s577_s26 = sadd.s32 (%p3119_p3), %s3016_s14, %s2092_s24 }
  0x46   : > { %s2079_s27 = sshll.u32 (%p3119_p3), %s577_s26, 2  ;;  %s3255_s18 = scalar_lea.vmem (%p3119_p3), [#allocation3], %s2904_s25 }
  0x49   : > { %s3250_s19 = scalar_lea.vmem %s3821_s3, %s2079_s27 }
  0x4a   : > { %v595_v48 = vld [vmem:[%s3250_s19] sm:$0xf]  ;;  %v597_v49 = vld [vmem:[%s3250_s19 + $0x8] sm:$0xf]  ;;  %v599_v50 = vld [vmem:[%s3250_s19 + $0x10] sm:$0xf] }
  0x4b   : > { %596 = vst [vmem:[%s3255_s18] sm:$0xf] %v595_v48  ;;  %598 = vst [vmem:[%s3255_s18 + $0x4] sm:$0xf] %v597_v49  ;;  %v601_v51 = vld [vmem:[%s3250_s19 + $0x18] sm:$0xf] }
  0x4c   : > { %600 = vst [vmem:[%s3255_s18 + $0x8] sm:$0xf] %v599_v50  ;;  %v603_v52 = vld [vmem:[%s3250_s19 + $0x20] sm:$0xf]  ;;  %v605_v53 = vld [vmem:[%s3250_s19 + $0x28] sm:$0xf] }
  0x4d   : > { %602 = vst [vmem:[%s3255_s18 + $0xc] sm:$0xf] %v601_v51  ;;  %604 = vst [vmem:[%s3255_s18 + $0x10] sm:$0xf] %v603_v52  ;;  %v607_v54 = vld [vmem:[%s3250_s19 + $0x30] sm:$0xf] }
  0x4e   : > { %606 = vst [vmem:[%s3255_s18 + $0x14] sm:$0xf] %v605_v53  ;;  %v609_v55 = vld [vmem:[%s3250_s19 + $0x38] sm:$0xf]  ;;  %v611_v56 = vld [vmem:[%s3250_s19 + $0x40] sm:$0xf] }
  0x4f   : > { %608 = vst [vmem:[%s3255_s18 + $0x18] sm:$0xf] %v607_v54  ;;  %610 = vst [vmem:[%s3255_s18 + $0x1c] sm:$0xf] %v609_v55  ;;  %v613_v57 = vld [vmem:[%s3250_s19 + $0x48] sm:$0xf] }
  0x50   : > { %612 = vst [vmem:[%s3255_s18 + $0x20] sm:$0xf] %v611_v56  ;;  %v615_v58 = vld [vmem:[%s3250_s19 + $0x50] sm:$0xf]  ;;  %v617_v59 = vld [vmem:[%s3250_s19 + $0x58] sm:$0xf] }
  0x51   : > { %614 = vst [vmem:[%s3255_s18 + $0x24] sm:$0xf] %v613_v57  ;;  %616 = vst [vmem:[%s3255_s18 + $0x28] sm:$0xf] %v615_v58  ;;  %v619_v60 = vld [vmem:[%s3250_s19 + $0x60] sm:$0xf] }
  0x52   : > { %618 = vst [vmem:[%s3255_s18 + $0x2c] sm:$0xf] %v617_v59  ;;  %v621_v61 = vld [vmem:[%s3250_s19 + $0x68] sm:$0xf]  ;;  %v623_v62 = vld [vmem:[%s3250_s19 + $0x70] sm:$0xf] }
  0x53   : > { %620 = vst [vmem:[%s3255_s18 + $0x30] sm:$0xf] %v619_v60  ;;  %622 = vst [vmem:[%s3255_s18 + $0x34] sm:$0xf] %v621_v61  ;;  %v625_v63 = vld [vmem:[%s3250_s19 + $0x78] sm:$0xf] }
  0x54   : > { %624 = vst [vmem:[%s3255_s18 + $0x38] sm:$0xf] %v623_v62  ;;  %v627_v0 = vld [vmem:[%s3250_s19 + $0x80] sm:$0xf]  ;;  %v629_v1 = vld [vmem:[%s3250_s19 + $0x88] sm:$0xf] }
  0x55   : > { %626 = vst [vmem:[%s3255_s18 + $0x3c] sm:$0xf] %v625_v63  ;;  %628 = vst [vmem:[%s3255_s18 + $0x40] sm:$0xf] %v627_v0  ;;  %v631_v2 = vld [vmem:[%s3250_s19 + $0x90] sm:$0xf] }
  0x56   : > { %630 = vst [vmem:[%s3255_s18 + $0x44] sm:$0xf] %v629_v1  ;;  %v633_v3 = vld [vmem:[%s3250_s19 + $0x98] sm:$0xf]  ;;  %v635_v4 = vld [vmem:[%s3250_s19 + $0xa0] sm:$0xf] }
  0x57   : > { %632 = vst [vmem:[%s3255_s18 + $0x48] sm:$0xf] %v631_v2  ;;  %634 = vst [vmem:[%s3255_s18 + $0x4c] sm:$0xf] %v633_v3  ;;  %v637_v5 = vld [vmem:[%s3250_s19 + $0xa8] sm:$0xf] }
  0x58   : > { %636 = vst [vmem:[%s3255_s18 + $0x50] sm:$0xf] %v635_v4  ;;  %v639_v6 = vld [vmem:[%s3250_s19 + $0xb0] sm:$0xf]  ;;  %v641_v7 = vld [vmem:[%s3250_s19 + $0xb8] sm:$0xf] }
  0x59   : > { %638 = vst [vmem:[%s3255_s18 + $0x54] sm:$0xf] %v637_v5  ;;  %640 = vst [vmem:[%s3255_s18 + $0x58] sm:$0xf] %v639_v6  ;;  %v643_v8 = vld [vmem:[%s3250_s19 + $0xc0] sm:$0xf] }
  0x5a   : > { %642 = vst [vmem:[%s3255_s18 + $0x5c] sm:$0xf] %v641_v7  ;;  %v645_v9 = vld [vmem:[%s3250_s19 + $0xc8] sm:$0xf]  ;;  %v647_v10 = vld [vmem:[%s3250_s19 + $0xd0] sm:$0xf] }
  0x5b   : > { %644 = vst [vmem:[%s3255_s18 + $0x60] sm:$0xf] %v643_v8  ;;  %646 = vst [vmem:[%s3255_s18 + $0x64] sm:$0xf] %v645_v9  ;;  %v649_v11 = vld [vmem:[%s3250_s19 + $0xd8] sm:$0xf] }
  0x5c   : > { %648 = vst [vmem:[%s3255_s18 + $0x68] sm:$0xf] %v647_v10  ;;  %v651_v12 = vld [vmem:[%s3250_s19 + $0xe0] sm:$0xf]  ;;  %v653_v13 = vld [vmem:[%s3250_s19 + $0xe8] sm:$0xf] }
  0x5d   : > { %650 = vst [vmem:[%s3255_s18 + $0x6c] sm:$0xf] %v649_v11  ;;  %652 = vst [vmem:[%s3255_s18 + $0x70] sm:$0xf] %v651_v12  ;;  %v655_v14 = vld [vmem:[%s3250_s19 + $0xf0] sm:$0xf] }
  0x5e   : > { %654 = vst [vmem:[%s3255_s18 + $0x74] sm:$0xf] %v653_v13  ;;  %v657_v15 = vld [vmem:[%s3250_s19 + $0xf8] sm:$0xf]  ;;  %v659_v16 = vld [vmem:[%s3250_s19 + $0x100] sm:$0xf] }
  0x5f   : > { %656 = vst [vmem:[%s3255_s18 + $0x78] sm:$0xf] %v655_v14  ;;  %658 = vst [vmem:[%s3255_s18 + $0x7c] sm:$0xf] %v657_v15  ;;  %v661_v17 = vld [vmem:[%s3250_s19 + $0x108] sm:$0xf] }
  0x60   : > { %660 = vst [vmem:[%s3255_s18 + $0x80] sm:$0xf] %v659_v16  ;;  %v663_v18 = vld [vmem:[%s3250_s19 + $0x110] sm:$0xf]  ;;  %v665_v19 = vld [vmem:[%s3250_s19 + $0x118] sm:$0xf] }
  0x61   : > { %662 = vst [vmem:[%s3255_s18 + $0x84] sm:$0xf] %v661_v17  ;;  %664 = vst [vmem:[%s3255_s18 + $0x88] sm:$0xf] %v663_v18  ;;  %v667_v20 = vld [vmem:[%s3250_s19 + $0x120] sm:$0xf] }
  0x62   : > { %666 = vst [vmem:[%s3255_s18 + $0x8c] sm:$0xf] %v665_v19  ;;  %v669_v21 = vld [vmem:[%s3250_s19 + $0x128] sm:$0xf]  ;;  %v671_v22 = vld [vmem:[%s3250_s19 + $0x130] sm:$0xf] }
  0x63   : > { %668 = vst [vmem:[%s3255_s18 + $0x90] sm:$0xf] %v667_v20  ;;  %670 = vst [vmem:[%s3255_s18 + $0x94] sm:$0xf] %v669_v21  ;;  %v673_v23 = vld [vmem:[%s3250_s19 + $0x138] sm:$0xf] }
  0x64   : > { %672 = vst [vmem:[%s3255_s18 + $0x98] sm:$0xf] %v671_v22  ;;  %v675_v24 = vld [vmem:[%s3250_s19 + $0x140] sm:$0xf]  ;;  %v677_v25 = vld [vmem:[%s3250_s19 + $0x148] sm:$0xf] }
  0x65   : > { %674 = vst [vmem:[%s3255_s18 + $0x9c] sm:$0xf] %v673_v23  ;;  %676 = vst [vmem:[%s3255_s18 + $0xa0] sm:$0xf] %v675_v24  ;;  %v679_v26 = vld [vmem:[%s3250_s19 + $0x150] sm:$0xf] }
  0x66   : > { %678 = vst [vmem:[%s3255_s18 + $0xa4] sm:$0xf] %v677_v25  ;;  %v681_v27 = vld [vmem:[%s3250_s19 + $0x158] sm:$0xf]  ;;  %v683_v28 = vld [vmem:[%s3250_s19 + $0x160] sm:$0xf] }
  0x67   : > { %680 = vst [vmem:[%s3255_s18 + $0xa8] sm:$0xf] %v679_v26  ;;  %682 = vst [vmem:[%s3255_s18 + $0xac] sm:$0xf] %v681_v27  ;;  %v685_v29 = vld [vmem:[%s3250_s19 + $0x168] sm:$0xf] }
  0x68   : > { %684 = vst [vmem:[%s3255_s18 + $0xb0] sm:$0xf] %v683_v28  ;;  %v687_v30 = vld [vmem:[%s3250_s19 + $0x170] sm:$0xf]  ;;  %v689_v31 = vld [vmem:[%s3250_s19 + $0x178] sm:$0xf] }
  0x69   : > { %686 = vst [vmem:[%s3255_s18 + $0xb4] sm:$0xf] %v685_v29  ;;  %688 = vst [vmem:[%s3255_s18 + $0xb8] sm:$0xf] %v687_v30 }
  0x6a   : > { %690 = vst [vmem:[%s3255_s18 + $0xbc] sm:$0xf] %v689_v31 }
  0x6b PF: > { %p2080_p7 = scmp.ge.s32.totalorder %s3020_s15, 1  ;;  %p834_p8 = scmp.lt.s32.totalorder %s3020_s15, 7 }
  0x6d   : > { %p835_p9 = pnand %p2080_p7, %p834_p8 }
  0x6e   : > { %s841_s20 = sand.u32 (!%p835_p9), 1, %s2996_s30   ;;  %s914_s21 = smul.u32 (!%p835_p9), 3, %s3004_s11 }
  0x6f   : > { %838 = sbr.rel (%p835_p9) target bundleno = 512 (0x200), region = 126  ;;  %p928_p10 = scmp.lt.s32.totalorder (!%p835_p9), %s3008_s12, 1 }
  0x70   : > { %s2905_s22 = smul.u32 (!%p835_p9), 192, %s841_s20  ;;  %p915_p11 = scmp.lt.s32.totalorder (!%p835_p9), %s914_s21, 8 }
  0x71   : > { %s3822_s0 = sld [smem:[#allocation7_spill]] (!%p835_p9)  ;;  %s3823_s1 = sld [smem:[#allocation8_spill]] (!%p835_p9) }
  0x72   : > { %s3398_s17 = scalar_lea.vmem (!%p835_p9), [#allocation2], %s2905_s22  ;;  %s3400_s14 = scalar_lea.vmem (!%p835_p9), [#allocation3], %s2905_s22 }
  0x73   : > { %p2087_p12 = scmp.ne.s32.totalorder (!%p835_p9), %s3004_s11, 0 }
  0x76   : > { %s3839_s21 = smov (!%p915_p11, %s914_s21), 8  ;;  %s3841_s12 = smov (!%p928_p10, %s3008_s12), 1 }
  0x77   : > { %s2081_s24 = sshll.u32 %s3839_s21, 3  ;;  %s2083_s19 = sshll.u32 %s3841_s12, 1  ;;  %v3022_v32 = vmov (!%p2087_p12), 0.0  }
  0x78   : > { %s3361_s27 = scalar_lea.vmem %s3822_s0, %s2081_s24  ;;  %s3366_s30 = scalar_lea.vmem %s3823_s1, %s2081_s24 }
  0x79   : > { %s3376_s16 = scalar_lea.vmem %s3803_s4, %s2083_s19  ;;  %s3381_s25 = scalar_lea.vmem %s3804_s5, %s2083_s19 }
  0x7a   : > { %s941_s24 = scalar_lea.vmem %s3806_s7, %s3841_s12  ;;  %s2085_s28 = sshll.u32 %s3841_s12, 3 }
  0x7b   : > { %s3391_s18 = scalar_lea.vmem %s3807_s8, %s2085_s28  ;;  %s3396_s3 = scalar_lea.vmem %s3808_s9, %s2085_s28 }
  0x7c   : > { %953 = sbr.rel (%p2087_p12) target bundleno = 131 (0x83), region = 138  ;;  %954 = vst [vmem:[%s3391_s18] sm:$0xff] (!%p2087_p12), %v3022_v32  ;;  %955 = vst [vmem:[%s3396_s3] sm:$0xff] (!%p2087_p12), %v3022_v32 }
  0x83 PF: > { %v3406_v33 = vld [vmem:[%s3398_s17 + $0x40] sm:$0xff]   ;;  %v3412_v35 = vld [vmem:[%s3398_s17 + $0x48] sm:$0xff]   ;;  %v3023_v36 = vmov 0.0|0.0   ;;  %v3430_v40 = vld [vmem:[%s3398_s17 + $0x50] sm:$0xff]   ;;  %vm3024_vm0 = vmmov 0   ;;  %v3025_v41 = vmov 0.0  }
  0x84   : > { %v3409_v34 = vld [vmem:[%s3398_s17] sm:$0xff]   ;;  %2680 = vmatprep.subr.bf16.mxu0 %v3406_v33  ;;  %2711 = vmatprep.subr.bf16.mxu1 %v3023_v36  ;;  %v3423_v38 = vld [vmem:[%s3398_s17 + $0x8] sm:$0xff]   ;;  %v3438_v42 = vld [vmem:[%s3398_s17 + $0x10] sm:$0xff]   ;;  %p2088_p13 = scmp.ne.s32.totalorder %s3004_s11, 2 }
  0x85   : > { %v3417_v37 = vld [vmem:[%s3398_s17 + $0x80] sm:$0xff]   ;;  %2682 = vmatpush3.bf16.msra.mxu0 %v3409_v34  ;;  %v3427_v39 = vld [vmem:[%s3398_s17 + $0x88] sm:$0xff]   ;;  %2571 = vmatprep.mubr.msk.f32.mxu1 %vm3024_vm0, %v3025_v41  ;;  %v3442_v43 = vld [vmem:[%s3398_s17 + $0x90] sm:$0xff]   ;;  %s3824_s2 = scalar_lea.vmem (!%p2088_p13), %s3805_s6, %s3841_s12 }
  0x86   : > { %2713 = vmatpush3.bf16.msra.mxu1 %v3417_v37  ;;  %2684 = vmatprep.subr.bf16.mxu0 %v3412_v35  ;;  %v3445_v44 = vld [vmem:[%s3361_s27 + $0x8] sm:$0xff]  ;;  %v3448_v45 = vld [vmem:[%s3398_s17 + $0x58] sm:$0xff]   ;;  %v3462_v48 = vld [vmem:[%s3398_s17 + $0x60] sm:$0xff]  }
  0x87   : > { %2714 = vmatprep.subr.bf16.mxu1 %v3023_v36  ;;  %1219 = vmatprep.mubr.f32.mxu0 %v3445_v44  ;;  %v3455_v46 = vld [vmem:[%s3398_s17 + $0x18] sm:$0xff]   ;;  %v3468_v49 = vld [vmem:[%s3398_s17 + $0x20] sm:$0xff]   ;;  %v3475_v51 = vld [vmem:[%s3398_s17 + $0x68] sm:$0xff]  }
  0x88   : > { %v3459_v47 = vld [vmem:[%s3398_s17 + $0x98] sm:$0xff]   ;;  %v3472_v50 = vld [vmem:[%s3398_s17 + $0xa0] sm:$0xff]   ;;  %v3481_v52 = vld [vmem:[%s3398_s17 + $0x28] sm:$0xff]  }
  0x89   : > { %2686 = vmatpush3.bf16.msra.mxu0 %v3423_v38  ;;  %v3485_v53 = vld [vmem:[%s3398_s17 + $0xa8] sm:$0xff]   ;;  %v3488_v54 = vld [vmem:[%s3398_s17 + $0x70] sm:$0xff]   ;;  %v3501_v57 = vld [vmem:[%s3398_s17 + $0x78] sm:$0xff]  }
  0x8a   : > { %2716 = vmatpush3.bf16.msra.mxu1 %v3427_v39  ;;  %2688 = vmatprep.subr.bf16.mxu0 %v3430_v40  ;;  %v3494_v55 = vld [vmem:[%s3398_s17 + $0x30] sm:$0xff]   ;;  %v3507_v58 = vld [vmem:[%s3398_s17 + $0x38] sm:$0xff]   ;;  %v3514_v60 = vld [vmem:[%s3400_s14 + $0x40] sm:$0xff]  }
  0x8b   : > { %2717 = vmatprep.subr.bf16.mxu1 %v3023_v36  ;;  %v3498_v56 = vld [vmem:[%s3398_s17 + $0xb0] sm:$0xff]   ;;  %v3511_v59 = vld [vmem:[%s3398_s17 + $0xb8] sm:$0xff]   ;;  %v3518_v61 = vld [vmem:[%s3361_s27] sm:$0xff] }
  0x8c   : > { %v3522_v62 = vld [vmem:[%s3361_s27 + $0x10] sm:$0xff]  ;;  %v3526_v63 = vld [vmem:[%s3400_s14] sm:$0xff]   ;;  %v3533_v1 = vld [vmem:[%s3400_s14 + $0x48] sm:$0xff]  }
  0x8d   : > { %2690 = vmatpush3.bf16.msra.mxu0 %v3438_v42  ;;  %v3530_v0 = vld [vmem:[%s3400_s14 + $0x80] sm:$0xff]   ;;  %v960_v2 = vld [vmem:[%s3366_s30 + $0x8] sm:$0xff]  ;;  %v3549_v5 = vld [vmem:[%s3400_s14 + $0x50] sm:$0xff]  }
  0x8e   : > { %2719 = vmatpush3.bf16.msra.mxu1 %v3442_v43  ;;  %2692 = vmatprep.subr.bf16.mxu0 %v3448_v45  ;;  %v3542_v3 = vld [vmem:[%s3400_s14 + $0x8] sm:$0xff]   ;;  %v3557_v6 = vld [vmem:[%s3400_s14 + $0x10] sm:$0xff]   ;;  %v3564_v8 = vld [vmem:[%s3400_s14 + $0x58] sm:$0xff]  }
  0x8f   : > { %2720 = vmatprep.subr.bf16.mxu1 %v3023_v36  ;;  %v3546_v4 = vld [vmem:[%s3400_s14 + $0x88] sm:$0xff]   ;;  %v3561_v7 = vld [vmem:[%s3400_s14 + $0x90] sm:$0xff]   ;;  %v3570_v9 = vld [vmem:[%s3400_s14 + $0x18] sm:$0xff]  }
  0x90   : > { %v3574_v10 = vld [vmem:[%s3400_s14 + $0x98] sm:$0xff]   ;;  %v3577_v11 = vld [vmem:[%s3400_s14 + $0x60] sm:$0xff]   ;;  %v3590_v14 = vld [vmem:[%s3400_s14 + $0x68] sm:$0xff]  }
  0x91   : > { %2694 = vmatpush3.bf16.msra.mxu0 %v3455_v46  ;;  %v3583_v12 = vld [vmem:[%s3400_s14 + $0x20] sm:$0xff]   ;;  %v3596_v15 = vld [vmem:[%s3400_s14 + $0x28] sm:$0xff]   ;;  %v3603_v17 = vld [vmem:[%s3400_s14 + $0x70] sm:$0xff]  }
  0x92   : > { %2722 = vmatpush3.bf16.msra.mxu1 %v3459_v47  ;;  %2696 = vmatprep.subr.bf16.mxu0 %v3462_v48  ;;  %v3587_v13 = vld [vmem:[%s3400_s14 + $0xa0] sm:$0xff]   ;;  %v3600_v16 = vld [vmem:[%s3400_s14 + $0xa8] sm:$0xff]   ;;  %v3609_v18 = vld [vmem:[%s3400_s14 + $0x30] sm:$0xff]  }
  0x93   : > { %2723 = vmatprep.subr.bf16.mxu1 %v3023_v36  ;;  %v3613_v19 = vld [vmem:[%s3400_s14 + $0xb0] sm:$0xff]   ;;  %v3616_v20 = vld [vmem:[%s3400_s14 + $0x78] sm:$0xff]   ;;  %v959_v23 = vld [vmem:[%s3366_s30] sm:$0xff] }
  0x94   : > { %v3622_v21 = vld [vmem:[%s3400_s14 + $0x38] sm:$0xff]   ;;  %v961_v24 = vld [vmem:[%s3366_s30 + $0x10] sm:$0xff] }
  0x95   : > { %2698 = vmatpush3.bf16.msra.mxu0 %v3468_v49  ;;  %v3626_v22 = vld [vmem:[%s3400_s14 + $0xb8] sm:$0xff]  }
  0x96   : > { %2725 = vmatpush3.bf16.msra.mxu1 %v3472_v50  ;;  %2700 = vmatprep.subr.bf16.mxu0 %v3475_v51 }
  0x97   : > { %2726 = vmatprep.subr.bf16.mxu1 %v3023_v36 }
  0x99   : > { %2702 = vmatpush3.bf16.msra.mxu0 %v3481_v52 }
  0x9a   : > { %2728 = vmatpush3.bf16.msra.mxu1 %v3485_v53  ;;  %2704 = vmatprep.subr.bf16.mxu0 %v3488_v54 }
  0x9b   : > { %2729 = vmatprep.subr.bf16.mxu1 %v3023_v36 }
  0x9d   : > { %2706 = vmatpush3.bf16.msra.mxu0 %v3494_v55 }
  0x9e   : > { %2731 = vmatpush3.bf16.msra.mxu1 %v3498_v56  ;;  %2708 = vmatprep.subr.bf16.mxu0 %v3501_v57 }
  0x9f   : > { %2732 = vmatprep.subr.bf16.mxu1 %v3023_v36 }
  0xa1   : > { %2710 = vmatpush3.bf16.msra.mxu0 %v3507_v58 }
  0xa2   : > { %2734 = vmatpush3.bf16.msra.mxu1 %v3511_v59  ;;  %2736 = vmatprep.subr.bf16.mxu0 %v3514_v60 }
  0xa3   : > { %2767 = vmatprep.subr.bf16.mxu1 %v3023_v36 }
  0xa4   : > { %1220 = vmatmul.mubr.f32.vlgmr.msra.gmra.mrb[0].mxu0 %v3518_v61 }
  0xa5   : > { %2572 = vmatmul.mubr.f32.vlgmr.msra.gmra.mrb[0].mxu1 %v3522_v62  ;;  %2738 = vmatpush3.bf16.msra.mxu0 %v3526_v63 }
  0xa6   : > { %2769 = vmatpush3.bf16.msra.mxu1 %v3530_v0  ;;  %2740 = vmatprep.subr.bf16.mxu0 %v3533_v1 }
  0xa7   : > { %2770 = vmatprep.subr.bf16.mxu1 %v3023_v36  ;;  %1359 = vmatprep.mubr.f32.mxu0 %v960_v2 }
  0xa8   : > { %2606 = vmatprep.mubr.msk.f32.mxu1 %vm3024_vm0, %v3025_v41 }
  0xa9   : > { %2742 = vmatpush3.bf16.msra.mxu0 %v3542_v3 }
  0xaa   : > { %2772 = vmatpush3.bf16.msra.mxu1 %v3546_v4  ;;  %2744 = vmatprep.subr.bf16.mxu0 %v3549_v5 }
  0xab   : > { %2773 = vmatprep.subr.bf16.mxu1 %v3023_v36 }
  0xad   : > { %2746 = vmatpush3.bf16.msra.mxu0 %v3557_v6 }
  0xae   : > { %2775 = vmatpush3.bf16.msra.mxu1 %v3561_v7  ;;  %2748 = vmatprep.subr.bf16.mxu0 %v3564_v8 }
  0xaf   : > { %2776 = vmatprep.subr.bf16.mxu1 %v3023_v36 }
  0xb1   : > { %2750 = vmatpush3.bf16.msra.mxu0 %v3570_v9 }
  0xb2   : > { %2778 = vmatpush3.bf16.msra.mxu1 %v3574_v10  ;;  %2752 = vmatprep.subr.bf16.mxu0 %v3577_v11 }
  0xb3   : > { %2779 = vmatprep.subr.bf16.mxu1 %v3023_v36 }
  0xb5   : > { %2754 = vmatpush3.bf16.msra.mxu0 %v3583_v12 }
  0xb6   : > { %2781 = vmatpush3.bf16.msra.mxu1 %v3587_v13  ;;  %2756 = vmatprep.subr.bf16.mxu0 %v3590_v14 }
  0xb7   : > { %2782 = vmatprep.subr.bf16.mxu1 %v3023_v36 }
  0xb9   : > { %2758 = vmatpush3.bf16.msra.mxu0 %v3596_v15 }
  0xba   : > { %2784 = vmatpush3.bf16.msra.mxu1 %v3600_v16  ;;  %2760 = vmatprep.subr.bf16.mxu0 %v3603_v17 }
  0xbb   : > { %2785 = vmatprep.subr.bf16.mxu1 %v3023_v36 }
  0xbd   : > { %2762 = vmatpush3.bf16.msra.mxu0 %v3609_v18 }
  0xbe   : > { %2787 = vmatpush3.bf16.msra.mxu1 %v3613_v19  ;;  %2764 = vmatprep.subr.bf16.mxu0 %v3616_v20 }
  0xbf   : > { %2788 = vmatprep.subr.bf16.mxu1 %v3023_v36 }
  0xc1   : > { %2766 = vmatpush3.bf16.msra.mxu0 %v3622_v21 }
  0xc2   : > { %2790 = vmatpush3.bf16.msra.mxu1 %v3626_v22  ;;  %2792 = vmatprep.subr.bf16.mxu0 %v3406_v33 }
  0xc3   : > { %2823 = vmatprep.subr.bf16.mxu1 %v3023_v36 }
  0xc4   : > { %1360 = vmatmul.mubr.f32.vlgmr.msra.gmra.mrb[2].mxu0 %v959_v23 }
  0xc5   : > { %2607 = vmatmul.mubr.f32.vlgmr.msra.gmra.mrb[2].mxu1 %v961_v24  ;;  %2794 = vmatpush3.bf16.msra.mxu0 %v3409_v34 }
  0xc6   : > { %2825 = vmatpush3.bf16.msra.mxu1 %v3417_v37  ;;  %2796 = vmatprep.subr.bf16.mxu0 %v3412_v35  ;;  %v1154_v37 = vld [vmem:[%s3391_s18] sm:$0xff] }
  0xc7   : > { %2826 = vmatprep.subr.bf16.mxu1 %v3023_v36  ;;  %1503 = vmatprep.mubr.f32.mxu0 %v960_v2 }
  0xc8   : > { %2641 = vmatprep.mubr.msk.f32.mxu1 %vm3024_vm0, %v3025_v41 }
  0xc9   : > { %2798 = vmatpush3.bf16.msra.mxu0 %v3423_v38 }
  0xca   : > { %2828 = vmatpush3.bf16.msra.mxu1 %v3427_v39  ;;  %2800 = vmatprep.subr.bf16.mxu0 %v3430_v40 }
  0xcb   : > { %2829 = vmatprep.subr.bf16.mxu1 %v3023_v36 }
  0xcd   : > { %2802 = vmatpush3.bf16.msra.mxu0 %v3438_v42 }
  0xce   : > { %2831 = vmatpush3.bf16.msra.mxu1 %v3442_v43  ;;  %2804 = vmatprep.subr.bf16.mxu0 %v3448_v45 }
  0xcf   : > { %2832 = vmatprep.subr.bf16.mxu1 %v3023_v36 }
  0xd1   : > { %2806 = vmatpush3.bf16.msra.mxu0 %v3455_v46 }
  0xd2   : > { %2834 = vmatpush3.bf16.msra.mxu1 %v3459_v47  ;;  %2808 = vmatprep.subr.bf16.mxu0 %v3462_v48 }
  0xd3   : > { %2835 = vmatprep.subr.bf16.mxu1 %v3023_v36 }
  0xd5   : > { %2810 = vmatpush3.bf16.msra.mxu0 %v3468_v49 }
  0xd6   : > { %2837 = vmatpush3.bf16.msra.mxu1 %v3472_v50  ;;  %2812 = vmatprep.subr.bf16.mxu0 %v3475_v51 }
  0xd7   : > { %2838 = vmatprep.subr.bf16.mxu1 %v3023_v36 }
  0xd9   : > { %2814 = vmatpush3.bf16.msra.mxu0 %v3481_v52  ;;  %v1438_v52 = vld [vmem:[%s3396_s3] sm:$0xff] }
  0xda   : > { %2840 = vmatpush3.bf16.msra.mxu1 %v3485_v53  ;;  %2816 = vmatprep.subr.bf16.mxu0 %v3488_v54 }
  0xdb   : > { %2841 = vmatprep.subr.bf16.mxu1 %v3023_v36 }
  0xdd   : > { %2818 = vmatpush3.bf16.msra.mxu0 %v3494_v55  ;;  %v1727_v55 = vld [vmem:[%s3376_s16] sm:$0x3] (!%p2088_p13) }
  0xde   : > { %2843 = vmatpush3.bf16.msra.mxu1 %v3498_v56  ;;  %2820 = vmatprep.subr.bf16.mxu0 %v3501_v57  ;;  %v1799_v56 = vlaneseq (!%p2088_p13)  ;;  %v1728_v57 = vld [vmem:[%s3381_s25] sm:$0x3] (!%p2088_p13) }
  0xdf   : > { %2844 = vmatprep.subr.bf16.mxu1 %v3023_v36 }
  0xe1   : > { %2822 = vmatpush3.bf16.msra.mxu0 %v3507_v58  ;;  %v1732_v58 = vrot.slane (!%p2088_p13), %v1727_v55, 7 }
  0xe2   : > { %2846 = vmatpush3.bf16.msra.mxu1 %v3511_v59  ;;  %2848 = vmatprep.subr.bf16.mxu0 %v3514_v60  ;;  %v1736_v59 = vrot.slane (!%p2088_p13), %v1728_v57, 7  ;;  %v1800_v60 = vshrl.u32 (!%p2088_p13), %v1799_v56, 7 }
  0xe3   : > { %2879 = vmatprep.subr.bf16.mxu1 %v3023_v36 }
  0xe4   : > { %1504 = vmatmul.mubr.f32.vlgmr.msra.gmra.mrb[4].mxu0 %v959_v23  ;;  %v1741_v2 = vmul.f32 (!%p2088_p13), %v1736_v59, %v1727_v55 }
  0xe5   : > { %2642 = vmatmul.mubr.f32.vlgmr.msra.gmra.mrb[4].mxu1 %v961_v24  ;;  %2850 = vmatpush3.bf16.msra.mxu0 %v3526_v63  ;;  %v1734_v63 = vmul.f32 (!%p2088_p13), %v1732_v58, %v1727_v55 }
  0xe6   : > { %2881 = vmatpush3.bf16.msra.mxu1 %v3530_v0  ;;  %2852 = vmatprep.subr.bf16.mxu0 %v3533_v1  ;;  %v1738_v0 = vmul.f32 (!%p2088_p13), %v1736_v59, %v1728_v57  ;;  %v1740_v1 = vmul.f32 (!%p2088_p13), %v1732_v58, %v1728_v57 }
  0xe7   : > { %2882 = vmatprep.subr.bf16.mxu1 %v3023_v36  ;;  %1643 = vmatprep.mubr.f32.mxu0 %v3445_v44 }
  0xe8   : > { %2676 = vmatprep.mubr.msk.f32.mxu1 %vm3024_vm0, %v3025_v41 }
  0xe9   : > { %2854 = vmatpush3.bf16.msra.mxu0 %v3542_v3 }
  0xea   : > { %2884 = vmatpush3.bf16.msra.mxu1 %v3546_v4  ;;  %2856 = vmatprep.subr.bf16.mxu0 %v3549_v5  ;;  %v1801_v5 = vsub.s32 (!%p2088_p13), 0, %v1800_v60 }
  0xeb   : > { %2885 = vmatprep.subr.bf16.mxu1 %v3023_v36 }
  0xed   : > { %2858 = vmatpush3.bf16.msra.mxu0 %v3557_v6  ;;  %v1739_v6 = vadd.f32 (!%p2088_p13), %v1738_v0, %v1734_v63 }
  0xee   : > { %2887 = vmatpush3.bf16.msra.mxu1 %v3561_v7  ;;  %2860 = vmatprep.subr.bf16.mxu0 %v3564_v8  ;;  %v1742_v7 = vsub.f32 (!%p2088_p13), %v1740_v1, %v1741_v2  ;;  %v3726_v8 = vsub.f32 (!%p2088_p13), %v1741_v2, %v1740_v1 }
  0xef   : > { %2888 = vmatprep.subr.bf16.mxu1 %v3023_v36 }
  0xf1   : > { %2862 = vmatpush3.bf16.msra.mxu0 %v3570_v9 }
  0xf2   : > { %2890 = vmatpush3.bf16.msra.mxu1 %v3574_v10  ;;  %2864 = vmatprep.subr.bf16.mxu0 %v3577_v11 }
  0xf3   : > { %2891 = vmatprep.subr.bf16.mxu1 %v3023_v36 }
  0xf5   : > { %2866 = vmatpush3.bf16.msra.mxu0 %v3583_v12 }
  0xf6   : > { %2893 = vmatpush3.bf16.msra.mxu1 %v3587_v13  ;;  %2868 = vmatprep.subr.bf16.mxu0 %v3590_v14 }
  0xf7   : > { %2894 = vmatprep.subr.bf16.mxu1 %v3023_v36 }
  0xf9   : > { %2870 = vmatpush3.bf16.msra.mxu0 %v3596_v15  ;;  %v1773_v15 = vrot.slane (!%p2088_p13), %v1739_v6, 1 }
  0xfa   : > { %2896 = vmatpush3.bf16.msra.mxu1 %v3600_v16  ;;  %2872 = vmatprep.subr.bf16.mxu0 %v3603_v17  ;;  %v1781_v16 = vrot.slane (!%p2088_p13), %v3726_v8, 1  ;;  %v1818_v17 = vrot.slane (!%p2088_p13), %v1739_v6, 6 }
  0xfb   : > { %2897 = vmatprep.subr.bf16.mxu1 %v3023_v36 }
  0xfd   : > { %2874 = vmatpush3.bf16.msra.mxu0 %v3609_v18  ;;  %v1826_v18 = vrot.slane (!%p2088_p13), %v1742_v7, 6 }
  0xfe   : > { %2899 = vmatpush3.bf16.msra.mxu1 %v3613_v19  ;;  %2876 = vmatprep.subr.bf16.mxu0 %v3616_v20 }
  0xff   : > { %2900 = vmatprep.subr.bf16.mxu1 %v3023_v36 }
 0x101   : > { %2878 = vmatpush3.bf16.msra.mxu0 %v3622_v21 }
 0x102   : > { %2902 = vmatpush3.bf16.msra.mxu1 %v3626_v22 }
 0x104   : > { %1644 = vmatmul.mubr.f32.vlgmr.msra.gmra.mrb[6].mxu0 %v3518_v61  ;;  %v1729_v61 = vld [vmem:[%s3824_s2] sm:$0x1] (!%p2088_p13) }
 0x105   : > { %2677 = vmatmul.mubr.f32.vlgmr.msra.gmra.mrb[6].mxu1 %v3522_v62  ;;  %v1730_v62 = vld [vmem:[%s941_s24] sm:$0x1] (!%p2088_p13)  ;;  %v3728_v9 = vrot.slane (!%p2088_p13), %v1729_v61, %v1801_v5 }
 0x106   : > { %v3730_v10 = vrot.slane (!%p2088_p13), %v1730_v62, %v1801_v5 }
 0x177   : > { %v2363_v25 = vpop.f32.mrb[0].mxu0 }
 0x178   : > { %v1291_v26 = vpop.f32.mrb[0].mxu1  ;;  %v2364_v27 = vpop.f32.mrb[1].mxu0 }
 0x179   : > { %v2573_v28 = vpop.f32.mrb[1].mxu1  ;;  %v2365_v29 = vadd.f32 %v2364_v27, %v2363_v25 }
 0x17b   : > { %v1292_v30 = vadd.f32 %v2365_v29, %v1291_v26 }
 0x197   : > { %v2415_v31 = vpop.f32.mrb[2].mxu0 }
 0x198   : > { %v1431_v32 = vpop.f32.mrb[2].mxu1  ;;  %v2416_v33 = vpop.f32.mrb[3].mxu0 }
 0x199   : > { %v2608_v34 = vpop.f32.mrb[3].mxu1  ;;  %v2417_v35 = vadd.f32 %v2416_v33, %v2415_v31 }
 0x19b   : > { %v1432_v36 = vadd.f32 %v2417_v35, %v1431_v32 }
 0x19d   : > { %v1435_v38 = vsub.f32 %v1292_v30, %v1432_v36 }
 0x19f   : > { %v1436_v39 = vadd.f32 %v1435_v38, %v1154_v37 }
 0x1a1   : > { %1437 = vst [vmem:[%s3391_s18] sm:$0xff] %v1436_v39 }
 0x1a8   : > { %v3721_v3 = vld [vmem:[%s3391_s18] sm:$0xff] (!%p2088_p13) }
 0x1a9   : > { %v1744_v11 = vmul.f32 (!%p2088_p13), %v1739_v6, %v3721_v3  ;;  %v1754_v13 = vmul.f32 (!%p2088_p13), %v1742_v7, %v3721_v3  ;;  %v1775_v23 = vmul.f32 (!%p2088_p13), %v1773_v15, %v3721_v3  ;;  %v1788_v25 = vmul.f32 (!%p2088_p13), %v1781_v16, %v3721_v3 }
 0x1aa   : > { %v1820_v29 = vmul.f32 (!%p2088_p13), %v1818_v17, %v3721_v3 }
 0x1ab   : > { %v1746_v19 = vrot.slane (!%p2088_p13), %v1744_v11, 1  ;;  %v1756_v21 = vrot.slane (!%p2088_p13), %v1754_v13, 1  ;;  %v1777_v31 = vrot.slane (!%p2088_p13), %v1775_v23, 7  ;;  %v1790_v33 = vrot.slane (!%p2088_p13), %v1788_v25, 7 }
 0x1ac   : > { %v1822_v37 = vrot.slane (!%p2088_p13), %v1820_v29, 1 }
 0x1ad   : > { %v1748_v27 = vadd.f32 (!%p2088_p13), %v1746_v19, %v3721_v3  ;;  %v1779_v39 = vadd.f32 (!%p2088_p13), %v1777_v31, %v3721_v3 }
 0x1b7   : > { %v2467_v40 = vpop.f32.mrb[4].mxu0 }
 0x1b8   : > { %v1575_v41 = vpop.f32.mrb[4].mxu1  ;;  %v2468_v42 = vpop.f32.mrb[5].mxu0 }
 0x1b9   : > { %v2643_v43 = vpop.f32.mrb[5].mxu1  ;;  %v2469_v44 = vadd.f32 %v2468_v42, %v2467_v40 }
 0x1bb   : > { %v1576_v45 = vadd.f32 %v2469_v44, %v1575_v41  ;;  %v1833_v41 = vmul.f32 (!%p2088_p13), %v1826_v18, %v3721_v3 }
 0x1d7   : > { %v2519_v46 = vpop.f32.mrb[6].mxu0 }
 0x1d8   : > { %v1715_v47 = vpop.f32.mrb[6].mxu1  ;;  %v2520_v48 = vpop.f32.mrb[7].mxu0 }
 0x1d9   : > { %v2678_v49 = vpop.f32.mrb[7].mxu1  ;;  %v2521_v50 = vadd.f32 %v2520_v48, %v2519_v46 }
 0x1da   : > { %v1824_v49 = vadd.f32 (!%p2088_p13), %v1822_v37, %v3721_v3 }
 0x1db   : > { %v1646_v51 = vadd.f32 %v2521_v50, %v1576_v45  ;;  %1724 = sbr.rel (%p2088_p13) target bundleno = 512 (0x200), region = 142  ;;  %v1835_v50 = vrot.slane (!%p2088_p13), %v1833_v41, 1 }
 0x1dd   : > { %v1716_v53 = vadd.f32 %v1715_v47, %v1646_v51 }
 0x1df   : > { %v1719_v54 = vadd.f32 %v1716_v53, %v1438_v52 }
 0x1e1   : > { %1720 = vst [vmem:[%s3396_s3] sm:$0xff] %v1719_v54  ;;  %v1851_v54 = vrot.slane (!%p2088_p13), %v1739_v6, 7 }
 0x1e8   : > { %v3724_v4 = vld [vmem:[%s3396_s3] sm:$0xff] }
 0x1e9   : > { %v1749_v12 = vmul.f32 %v1742_v7, %v3724_v4  ;;  %v1759_v14 = vmul.f32 %v1739_v6, %v3724_v4  ;;  %v1783_v24 = vmul.f32 %v1781_v16, %v3724_v4  ;;  %v1793_v26 = vmul.f32 %v1773_v15, %v3724_v4 }
 0x1ea   : > { %v1758_v28 = vadd.f32 %v1756_v21, %v3724_v4  ;;  %v1828_v30 = vmul.f32 %v1826_v18, %v3724_v4  ;;  %v1792_v40 = vadd.f32 %v1790_v33, %v3724_v4  ;;  %v1838_v42 = vmul.f32 %v1818_v17, %v3724_v4 }
 0x1eb   : > { %v1751_v20 = vrot.slane %v1749_v12, 1  ;;  %v1761_v22 = vrot.slane %v1759_v14, 1  ;;  %v1785_v32 = vrot.slane %v1783_v24, 7  ;;  %v1795_v34 = vrot.slane %v1793_v26, 7 }
 0x1ec   : > { %v1830_v38 = vrot.slane %v1828_v30, 1  ;;  %v1840_v53 = vrot.slane %v1838_v42, 1  ;;  %v1837_v60 = vadd.f32 %v1835_v50, %v3724_v4  ;;  %v1870_v1 = vmul.f32 %v1851_v54, %v3724_v4 }
 0x1ed   : > { %v1753_v35 = vsub.f32 %v1748_v27, %v1751_v20  ;;  %v1763_v36 = vadd.f32 %v1761_v22, %v1758_v28  ;;  %v1787_v47 = vsub.f32 %v1779_v39, %v1785_v32  ;;  %v1797_v48 = vadd.f32 %v1795_v34, %v1792_v40 }
 0x1ee   : > { %v1832_v59 = vsub.f32 %v1824_v49, %v1830_v38  ;;  %v1842_v2 = vadd.f32 %v1840_v53, %v1837_v60  ;;  %v1872_v17 = vrot.slane %v1870_v1, 7 }
 0x1ef   : > { %v1764_v43 = vmul.f32 %v1753_v35, %v1729_v61  ;;  %v1765_v44 = vmul.f32 %v1763_v36, %v1730_v62  ;;  %v1768_v45 = vmul.f32 %v1753_v35, %v1730_v62  ;;  %v1769_v46 = vmul.f32 %v1763_v36, %v1729_v61 }
 0x1f0   : > { %v1804_v55 = vmul.f32 %v3728_v9, %v1787_v47  ;;  %v1811_v56 = vmul.f32 %v3730_v10, %v1797_v48  ;;  %v1814_v57 = vmul.f32 %v3730_v10, %v1787_v47  ;;  %v1815_v58 = vmul.f32 %v3728_v9, %v1797_v48 }
 0x1f1   : > { %v1766_v51 = vsub.f32 %v1764_v43, %v1765_v44  ;;  %v1770_v52 = vadd.f32 %v1769_v46, %v1768_v45  ;;  %v1853_v61 = vmul.f32 %v1851_v54, %v3721_v3  ;;  %v1858_v62 = vrot.slane %v3726_v8, 7 }
 0x1f2   : > { %v1812_v63 = vsub.f32 %v1804_v55, %v1811_v56  ;;  %v1816_v0 = vadd.f32 %v1815_v58, %v1814_v57  ;;  %v1843_v5 = vmul.f32 %v1832_v59, %v3728_v9  ;;  %v1847_v6 = vmul.f32 %v1832_v59, %v3730_v10 }
 0x1f3   : > { %1767 = vst [vmem:[%s3391_s18] sm:$0x1] %v1766_v51  ;;  %1771 = vst [vmem:[%s3396_s3] sm:$0x1] %v1770_v52  ;;  %v1855_v7 = vrot.slane %v1853_v61, 7  ;;  %v1860_v11 = vmul.f32 %v1858_v62, %v3724_v4  ;;  %v1865_v12 = vmul.f32 %v1858_v62, %v3721_v3  ;;  %v1844_v8 = vmul.f32 %v1842_v2, %v3730_v10 }
 0x1f4   : > { %1813 = vst [vmem:[%s3391_s18] sm:$0x2] %v1812_v63  ;;  %1817 = vst [vmem:[%s3396_s3] sm:$0x2] %v1816_v0  ;;  %v1848_v13 = vmul.f32 %v1842_v2, %v3728_v9 }
 0x1f5   : > { %v1857_v14 = vadd.f32 %v1855_v7, %v3721_v3  ;;  %v1862_v15 = vrot.slane %v1860_v11, 7  ;;  %v1867_v16 = vrot.slane %v1865_v12, 7  ;;  %v1845_v18 = vsub.f32 %v1843_v5, %v1844_v8 }
 0x1f6   : > { %v1849_v19 = vadd.f32 %v1848_v13, %v1847_v6 }
 0x1f7   : > { %v1864_v20 = vsub.f32 %v1857_v14, %v1862_v15  ;;  %v1869_v21 = vadd.f32 %v1867_v16, %v3724_v4  ;;  %1846 = vst [vmem:[%s3391_s18] sm:$0x4] %v1845_v18 }
 0x1f8   : > { %1850 = vst [vmem:[%s3396_s3] sm:$0x4] %v1849_v19 }
 0x1f9   : > { %v1874_v22 = vadd.f32 %v1872_v17, %v1869_v21  ;;  %v1875_v23 = vmul.f32 %v1864_v20, %v3728_v9  ;;  %v1879_v24 = vmul.f32 %v1864_v20, %v3730_v10 }
 0x1fb   : > { %v1876_v25 = vmul.f32 %v1874_v22, %v3730_v10  ;;  %v1880_v3 = vmul.f32 %v1874_v22, %v3728_v9 }
 0x1fd   : > { %v1877_v26 = vsub.f32 %v1875_v23, %v1876_v25  ;;  %v1881_v27 = vadd.f32 %v1880_v3, %v1879_v24 }
 0x1ff   : > { %1878 = vst [vmem:[%s3391_s18] sm:$0x8] %v1877_v26  ;;  %1882 = vst [vmem:[%s3396_s3] sm:$0x8] %v1881_v27 }
 0x200 PF: > { %s20_s15 = sadd.s32 1, %s3020_s15   ;;  %s3825_s12 = sld [smem:[#allocation4_spill]] }
 0x201   : > { %p17_p0 = scmp.ge.s32.totalorder %s20_s15, 8   ;;  %s3826_s16 = sld [smem:[#allocation5_spill]] }
 0x202   : > { %s3827_s14 = sld [smem:[#allocation6_spill]]  ;;  %s3828_s30 = smov %s3000_s10 }
 0x203   : > { %s3829_s10 = smov %s3131_s23  ;;  %s3830_s11 = smov %s3012_s13 }
 0x204   :  { %19 = sbr.rel (!%p17_p0) target bundleno = 9 (0x9), region = 215 }
 0x207   : > { %s3831_s13 = smov %s3826_s16 }

</bundles_post_ra>
